<compile_context>
chip_gen: v7x
topology: tpu7x:2x2x1
jax: 0.10.0
libtpu: 0.0.40
codegen_flags: <defaults>
</compile_context>

<pallas_src>
import functools

import jax
import jax.numpy as jnp
from jax.experimental import pallas as pl
from jax.experimental.pallas import tpu as pltpu


# ---------------------------------------------------------------------------
# Fused kernel: conv1..conv3 (+ReLU) and fc1..fc4 for the whole (small) batch.
# ---------------------------------------------------------------------------
def _fused_forward_kernel(
    x_ref,                       # (nb*H, W*Cin) f32 batch-stacked input slab
    m1_ref, br1_ref,             # conv1 banded weights (bf16) / bias row (f32)
    m2_ref, br2_ref,             # conv2
    m3_ref, br3_ref,             # conv3
    w1_hbm_ref, b1_ref,          # fc1 weight (800, 512) bf16 in HBM, bias f32
    w2_ref, b2_ref,              # fc2 (512, 128) bf16
    w3_ref, b3_ref,              # fc3 (128, 64)  bf16
    w4_ref, b4_ref,              # fc4 (64, A)    bf16
    o_ref,                       # (nb, A) f32 output
    w1_vmem,                     # VMEM scratch for the fc1 weight
    w1_sem,                      # DMA completion semaphore
    flat_ref,                    # (nb, Ho3*Wo3*C3) f32 flatten scratch
    *, nb, img_h,
):
    f32 = jnp.float32
    bf16 = jnp.bfloat16

    # Kick off the big fc1-weight HBM->VMEM DMA immediately so it overlaps the
    # conv stack (w1 is ~70% of all weight bytes).
    w1_copy = pltpu.make_async_copy(w1_hbm_ref, w1_vmem, w1_sem)
    w1_copy.start()

    # ---- conv stack on the batch-stacked slab: 3x3 valid conv + ReLU -------
    # Each layer is 3 row-shifted MXU matmuls (im2col is baked into the
    # banded weights); operands bf16, accumulation / bias / ReLU in f32.
    a = x_ref[...]                                          # (nb*H, W*Cin) f32
    for m_ref, br_ref in ((m1_ref, br1_ref), (m2_ref, br2_ref),
                          (m3_ref, br3_ref)):
        ab = a.astype(bf16)
        rows = a.shape[0] - 2
        acc = (jnp.dot(ab[0:rows, :], m_ref[0], preferred_element_type=f32)
               + jnp.dot(ab[1:rows + 1, :], m_ref[1], preferred_element_type=f32)
               + jnp.dot(ab[2:rows + 2, :], m_ref[2], preferred_element_type=f32))
        a = jnp.maximum(acc + br_ref[...], 0.0)             # f32

    # ---- flatten per-batch valid conv3 rows into an (nb, Ho3*Wo3*C3) slab --
    # Rows of the stacked slab that straddle a batch boundary are junk and are
    # simply skipped here (never read by fc1).
    ho3 = img_h - 6
    wc3 = a.shape[1]
    for n in range(nb):
        for r in range(ho3):
            row = n * img_h + r
            flat_ref[pl.ds(n, 1), pl.ds(r * wc3, wc3)] = a[row:row + 1, :]

    # fc1 weight must be resident before the first FF matmul.
    w1_copy.wait()

    # ---- FF stack, batched over the whole batch: one matmul per layer ------
    flat = flat_ref[...].astype(bf16)                       # (nb, 800)
    h = jnp.maximum(
        jnp.dot(flat, w1_vmem[...], preferred_element_type=f32) + b1_ref[...],
        0.0)
    h = jnp.maximum(
        jnp.dot(h.astype(bf16), w2_ref[...], preferred_element_type=f32)
        + b2_ref[...], 0.0)
    h = jnp.maximum(
        jnp.dot(h.astype(bf16), w3_ref[...], preferred_element_type=f32)
        + b3_ref[...], 0.0)
    out = (jnp.dot(h.astype(bf16), w4_ref[...], preferred_element_type=f32)
           + b4_ref[...])
    o_ref[...] = out.astype(o_ref.dtype)


def _full_spec(shape):
    nd = len(shape)
    return pl.BlockSpec(shape, lambda i: (0,) * nd)


def fused_forward(kparams, x_nchw):
    """Forward pass matching DQNConvNStepBusBased.forward (NCHW input)."""
    nb, c, h, w = x_nchw.shape
    # TODO(synk): if the caller can supply NHWC (or this call sits inside a
    # larger jit), drop/fuse this tiny input relayout.
    x_slab = jnp.transpose(x_nchw, (0, 2, 3, 1)).reshape(nb * h, w * c)

    actions_n = kparams["w4"].shape[1]
    k_flat = kparams["w1"].shape[0]                     # Ho3*Wo3*C3

    ins = (x_slab,
           kparams["m1"], kparams["br1"],
           kparams["m2"], kparams["br2"],
           kparams["m3"], kparams["br3"],
           kparams["w1"], kparams["b1"],
           kparams["w2"], kparams["b2"],
           kparams["w3"], kparams["b3"],
           kparams["w4"], kparams["b4"])
    W1_IDX = 7                                          # fc1 weight stays in HBM
    in_specs = [
        pl.BlockSpec(memory_space=pl.ANY) if i == W1_IDX else _full_spec(a.shape)
        for i, a in enumerate(ins)
    ]

    kernel = functools.partial(_fused_forward_kernel, nb=nb, img_h=h)

    # TODO(synk): on v7x (2 TensorCores/chip) split the batch across cores via
    # grid=(nb,) + "parallel" index_maps; on v5e/v6e (single TC) the single
    # resident launch below is the fastest option.
    return pl.pallas_call(
        kernel,
        out_shape=jax.ShapeDtypeStruct((nb, actions_n), jnp.float32),
        grid=(1,),
        in_specs=in_specs,
        out_specs=_full_spec((nb, actions_n)),
        scratch_shapes=[
            pltpu.VMEM(kparams["w1"].shape, kparams["w1"].dtype),
            pltpu.SemaphoreType.DMA(()),
            pltpu.VMEM((nb, k_flat), jnp.float32),
        ],
        compiler_params=pltpu.CompilerParams(
            dimension_semantics=("arbitrary",)),
    )(*ins)


# ---------------------------------------------------------------------------
# Parameter init (PyTorch layouts, uniform(-1/sqrt(fan_in), 1/sqrt(fan_in)))
# ---------------------------------------------------------------------------
def _uniform(key, shape, fan_in):
    bound = float(fan_in) ** -0.5
    return jax.random.uniform(key, shape, jnp.float32, -bound, bound)


def init_params(key, shape, actions_n):
    c, h, w = shape
    keys = jax.random.split(key, 14)
    p = {}
    p["c1_w"] = _uniform(keys[0], (8, c, 3, 3), c * 9)
    p["c1_b"] = _uniform(keys[1], (8,), c * 9)
    p["c2_w"] = _uniform(keys[2], (8, 8, 3, 3), 8 * 9)
    p["c2_b"] = _uniform(keys[3], (8,), 8 * 9)
    p["c3_w"] = _uniform(keys[4], (8, 8, 3, 3), 8 * 9)
    p["c3_b"] = _uniform(keys[5], (8,), 8 * 9)
    ho, wo = h - 6, w - 6
    out_size = 8 * ho * wo
    p["f1_w"] = _uniform(keys[6], (512, out_size), out_size)
    p["f1_b"] = _uniform(keys[7], (512,), out_size)
    p["f2_w"] = _uniform(keys[8], (128, 512), 512)
    p["f2_b"] = _uniform(keys[9], (128,), 512)
    p["f3_w"] = _uniform(keys[10], (64, 128), 128)
    p["f3_b"] = _uniform(keys[11], (64,), 128)
    p["f4_w"] = _uniform(keys[12], (actions_n, 64), 64)
    p["f4_b"] = _uniform(keys[13], (actions_n,), 64)
    return p, out_size


# ---------------------------------------------------------------------------
# One-time weight preparation (runs outside the forward path)
# ---------------------------------------------------------------------------
def _banded_conv_weight(w_oihw, w_in):
    """Fold a KHxKW valid conv into KH banded matmul matrices.

    Returns m with shape (KH, w_in*Cin, w_out*Cout) such that, for an
    activation slab a[h, w*Cin + c] (HWC-flattened rows), the conv output is
        out[ho, wo*Cout + o] = sum_kh (a[kh:kh+Ho, :] @ m[kh])[ho, wo*Cout + o].
    """
    o_ch, c_in, k_h, k_w = w_oihw.shape
    w_out = w_in - k_w + 1
    wk = jnp.transpose(w_oihw, (2, 3, 1, 0))            # (KH, KW, Cin, O)
    col = jnp.arange(w_in)[:, None]                     # absolute input column
    out_col = jnp.arange(w_out)[None, :]                # output column
    tap = col - out_col                                 # (w_in, w_out)
    valid = (tap >= 0) & (tap < k_w)
    m = wk[:, jnp.clip(tap, 0, k_w - 1)]                # (KH, w_in, w_out, Cin, O)
    m = jnp.where(valid[None, :, :, None, None], m, 0.0)
    m = jnp.transpose(m, (0, 1, 3, 2, 4))               # (KH, w_in, Cin, w_out, O)
    return m.reshape(k_h, w_in * c_in, w_out * o_ch)


def prepare_kernel_params(params, shape):
    """Convert PyTorch-layout params into kernel-native layouts (one-time cost).

    MXU weight operands are stored in bfloat16; biases stay float32.
    """
    _, h, w = shape
    bf16 = jnp.bfloat16
    kp = {}
    w_in1, w_in2, w_in3 = w, w - 2, w - 4
    kp["m1"] = _banded_conv_weight(params["c1_w"], w_in1).astype(bf16)
    kp["m2"] = _banded_conv_weight(params["c2_w"], w_in2).astype(bf16)
    kp["m3"] = _banded_conv_weight(params["c3_w"], w_in3).astype(bf16)
    kp["br1"] = jnp.tile(params["c1_b"], (w_in1 - 2,))[None, :]
    kp["br2"] = jnp.tile(params["c2_b"], (w_in2 - 2,))[None, :]
    kp["br3"] = jnp.tile(params["c3_b"], (w_in3 - 2,))[None, :]

    c3 = params["c3_w"].shape[0]                       # conv output channels (8)
    ho3, wo3 = h - 6, w - 6
    n1 = params["f1_w"].shape[0]                       # 512
    # fc1: absorb PyTorch's NCHW .view(N, -1) flatten; K rows ordered
    # (conv_row, conv_col, channel) to match the kernel's on-chip flatten.
    w1 = params["f1_w"].reshape(n1, c3, ho3, wo3)      # (j, c, h, w)
    w1 = jnp.transpose(w1, (2, 3, 1, 0))               # (h, w, c, j)
    kp["w1"] = w1.reshape(ho3 * wo3 * c3, n1).astype(bf16)
    kp["b1"] = params["f1_b"][None, :]
    kp["w2"] = params["f2_w"].T.astype(bf16)
    kp["b2"] = params["f2_b"][None, :]
    kp["w3"] = params["f3_w"].T.astype(bf16)
    kp["b3"] = params["f3_b"][None, :]
    kp["w4"] = params["f4_w"].T.astype(bf16)
    kp["b4"] = params["f4_b"][None, :]
    return kp


# ---------------------------------------------------------------------------
# Plain-JAX f32 reference (mirrors the PyTorch module), for validation only.
# ---------------------------------------------------------------------------
def reference_forward(params, x_nchw):
    hp = jax.lax.Precision.HIGHEST

    def conv_relu(x, w, b):
        y = jax.lax.conv_general_dilated(
            x, w, window_strides=(1, 1), padding="VALID",
            dimension_numbers=("NCHW", "OIHW", "NCHW"), precision=hp)
        return jnp.maximum(y + b[None, :, None, None], 0.0)

    h = conv_relu(x_nchw, params["c1_w"], params["c1_b"])
    h = conv_relu(h, params["c2_w"], params["c2_b"])
    h = conv_relu(h, params["c3_w"], params["c3_b"])
    flat = h.reshape(x_nchw.shape[0], -1)
    h = jnp.maximum(jnp.dot(flat, params["f1_w"].T, precision=hp) + params["f1_b"], 0.0)
    h = jnp.maximum(jnp.dot(h, params["f2_w"].T, precision=hp) + params["f2_b"], 0.0)
    h = jnp.maximum(jnp.dot(h, params["f3_w"].T, precision=hp) + params["f3_b"], 0.0)
    return jnp.dot(h, params["f4_w"].T, precision=hp) + params["f4_b"]


if __name__ == "__main__":
    key = jax.random.PRNGKey(0)
    k_param, k_x = jax.random.split(key)

    shape = (4, 16, 16)          # (C, H, W), as in the PyTorch module's `shape`
    actions_n = 6
    batch = 2

    params, out_size = init_params(k_param, shape, actions_n)
    kparams = prepare_kernel_params(params, shape)     # one-time layout prep
    x = jax.random.normal(k_x, (batch,) + shape, dtype=jnp.float32)

    fwd = jax.jit(fused_forward)
    result = jax.block_until_ready(fwd(kparams, x))
    assert result.shape == (batch, actions_n)
    assert result.dtype == jnp.float32

    ref = jax.block_until_ready(reference_forward(params, x))
    max_err = float(jnp.max(jnp.abs(result - ref)))
    # bf16 MXU operands vs. the f32/HIGHEST reference -> slightly looser bound
    # than the all-f32 version (observed error is O(1e-4) at these scales).
    assert max_err < 5e-3, f"kernel/reference mismatch, max abs err={max_err}"

    print("KERNEL_OK")
</pallas_src>

<mosaic_0001>
module attributes {stable_mosaic.version = 11 : i64} {
  func.func @_fused_forward_kernel(%arg0: i32, %arg1: memref<32x64xf32, #tpu.memory_space<vmem>>, %arg2: memref<3x64x112xbf16, #tpu.memory_space<vmem>>, %arg3: memref<1x112xf32, #tpu.memory_space<vmem>>, %arg4: memref<3x112x96xbf16, #tpu.memory_space<vmem>>, %arg5: memref<1x96xf32, #tpu.memory_space<vmem>>, %arg6: memref<3x96x80xbf16, #tpu.memory_space<vmem>>, %arg7: memref<1x80xf32, #tpu.memory_space<vmem>>, %arg8: memref<800x512xbf16, #tpu.memory_space<any>>, %arg9: memref<1x512xf32, #tpu.memory_space<vmem>>, %arg10: memref<512x128xbf16, #tpu.memory_space<vmem>>, %arg11: memref<1x128xf32, #tpu.memory_space<vmem>>, %arg12: memref<128x64xbf16, #tpu.memory_space<vmem>>, %arg13: memref<1x64xf32, #tpu.memory_space<vmem>>, %arg14: memref<64x6xbf16, #tpu.memory_space<vmem>>, %arg15: memref<1x6xf32, #tpu.memory_space<vmem>>, %arg16: memref<2x6xf32, #tpu.memory_space<vmem>>, %arg17: memref<800x512xbf16, #tpu.memory_space<vmem>>, %arg18: memref<!tpu.dma_semaphore, #tpu.memory_space<semaphore_mem>>, %arg19: memref<2x800xf32, #tpu.memory_space<vmem>>) attributes {dimension_semantics = [#tpu.dimension_semantics<arbitrary>], iteration_bounds = array<i64: 1>, scalar_prefetch = 0 : i64, scratch_operands = 3 : i64, tpu.core_type = #tpu.core_type<tc>, window_params = [{pipeline_mode = #tpu.pipeline_mode<synchronous>, transform_indices = @transform_0, window_bounds = array<i64: 32, 64>}, {pipeline_mode = #tpu.pipeline_mode<synchronous>, transform_indices = @transform_1, window_bounds = array<i64: 3, 64, 112>}, {pipeline_mode = #tpu.pipeline_mode<synchronous>, transform_indices = @transform_2, window_bounds = array<i64: 1, 112>}, {pipeline_mode = #tpu.pipeline_mode<synchronous>, transform_indices = @transform_3, window_bounds = array<i64: 3, 112, 96>}, {pipeline_mode = #tpu.pipeline_mode<synchronous>, transform_indices = @transform_4, window_bounds = array<i64: 1, 96>}, {pipeline_mode = #tpu.pipeline_mode<synchronous>, transform_indices = @transform_5, window_bounds = array<i64: 3, 96, 80>}, {pipeline_mode = #tpu.pipeline_mode<synchronous>, transform_indices = @transform_6, window_bounds = array<i64: 1, 80>}, {}, {pipeline_mode = #tpu.pipeline_mode<synchronous>, transform_indices = @transform_8, window_bounds = array<i64: 1, 512>}, {pipeline_mode = #tpu.pipeline_mode<synchronous>, transform_indices = @transform_9, window_bounds = array<i64: 512, 128>}, {pipeline_mode = #tpu.pipeline_mode<synchronous>, transform_indices = @transform_10, window_bounds = array<i64: 1, 128>}, {pipeline_mode = #tpu.pipeline_mode<synchronous>, transform_indices = @transform_11, window_bounds = array<i64: 128, 64>}, {pipeline_mode = #tpu.pipeline_mode<synchronous>, transform_indices = @transform_12, window_bounds = array<i64: 1, 64>}, {pipeline_mode = #tpu.pipeline_mode<synchronous>, transform_indices = @transform_13, window_bounds = array<i64: 64, 6>}, {pipeline_mode = #tpu.pipeline_mode<synchronous>, transform_indices = @transform_14, window_bounds = array<i64: 1, 6>}, {pipeline_mode = #tpu.pipeline_mode<synchronous>, transform_indices = @transform_15, window_bounds = array<i64: 2, 6>}]} {
    tpu.enqueue_dma source(%arg8 : memref<800x512xbf16, #tpu.memory_space<any>>) target(%arg17 : memref<800x512xbf16, #tpu.memory_space<vmem>>) target_semaphore(%arg18 : memref<!tpu.dma_semaphore, #tpu.memory_space<semaphore_mem>>)
    %c0 = arith.constant 0 : index
    %c0_0 = arith.constant 0 : index
    %0 = vector.load %arg1[%c0, %c0_0] : memref<32x64xf32, #tpu.memory_space<vmem>>, vector<32x64xf32>
    %1 = arith.truncf %0 : vector<32x64xf32> to vector<32x64xbf16>
    %2 = vector.extract_strided_slice %1 {offsets = [0, 0], sizes = [30, 64], strides = [1, 1]} : vector<32x64xbf16> to vector<30x64xbf16>
    %c0_1 = arith.constant 0 : index
    %c0_2 = arith.constant 0 : index
    %c0_3 = arith.constant 0 : index
    %3 = vector.load %arg2[%c0_1, %c0_2, %c0_3] : memref<3x64x112xbf16, #tpu.memory_space<vmem>>, vector<1x64x112xbf16>
    %4 = vector.shape_cast %3 : vector<1x64x112xbf16> to vector<64x112xbf16>
    %cst = arith.constant dense<0.000000e+00> : vector<30x112xf32>
    %5 = tpu.matmul %2, %4, %cst {dimension_numbers = #tpu.dot_dimension_numbers<[1], [0], [0], [1], [0, 0, 1, 1], [], []>} : vector<30x64xbf16>, vector<64x112xbf16>, vector<30x112xf32> -> vector<30x112xf32>
    %6 = vector.extract_strided_slice %1 {offsets = [1, 0], sizes = [30, 64], strides = [1, 1]} : vector<32x64xbf16> to vector<30x64xbf16>
    %c1 = arith.constant 1 : index
    %c0_4 = arith.constant 0 : index
    %c0_5 = arith.constant 0 : index
    %7 = vector.load %arg2[%c1, %c0_4, %c0_5] : memref<3x64x112xbf16, #tpu.memory_space<vmem>>, vector<1x64x112xbf16>
    %8 = vector.shape_cast %7 : vector<1x64x112xbf16> to vector<64x112xbf16>
    %cst_6 = arith.constant dense<0.000000e+00> : vector<30x112xf32>
    %9 = tpu.matmul %6, %8, %cst_6 {dimension_numbers = #tpu.dot_dimension_numbers<[1], [0], [0], [1], [0, 0, 1, 1], [], []>} : vector<30x64xbf16>, vector<64x112xbf16>, vector<30x112xf32> -> vector<30x112xf32>
    %10 = arith.addf %5, %9 : vector<30x112xf32>
    %11 = vector.extract_strided_slice %1 {offsets = [2, 0], sizes = [30, 64], strides = [1, 1]} : vector<32x64xbf16> to vector<30x64xbf16>
    %c2 = arith.constant 2 : index
    %c0_7 = arith.constant 0 : index
    %c0_8 = arith.constant 0 : index
    %12 = vector.load %arg2[%c2, %c0_7, %c0_8] : memref<3x64x112xbf16, #tpu.memory_space<vmem>>, vector<1x64x112xbf16>
    %13 = vector.shape_cast %12 : vector<1x64x112xbf16> to vector<64x112xbf16>
    %cst_9 = arith.constant dense<0.000000e+00> : vector<30x112xf32>
    %14 = tpu.matmul %11, %13, %cst_9 {dimension_numbers = #tpu.dot_dimension_numbers<[1], [0], [0], [1], [0, 0, 1, 1], [], []>} : vector<30x64xbf16>, vector<64x112xbf16>, vector<30x112xf32> -> vector<30x112xf32>
    %15 = arith.addf %10, %14 : vector<30x112xf32>
    %c0_10 = arith.constant 0 : index
    %c0_11 = arith.constant 0 : index
    %16 = vector.load %arg3[%c0_10, %c0_11] : memref<1x112xf32, #tpu.memory_space<vmem>>, vector<1x112xf32>
    %17 = vector.broadcast %16 : vector<1x112xf32> to vector<30x112xf32>
    %18 = arith.addf %15, %17 : vector<30x112xf32>
    %cst_12 = arith.constant 0.000000e+00 : f32
    %19 = vector.broadcast %cst_12 : f32 to vector<30x112xf32>
    %20 = arith.maximumf %18, %19 : vector<30x112xf32>
    %21 = arith.truncf %20 : vector<30x112xf32> to vector<30x112xbf16>
    %22 = vector.extract_strided_slice %21 {offsets = [0, 0], sizes = [28, 112], strides = [1, 1]} : vector<30x112xbf16> to vector<28x112xbf16>
    %c0_13 = arith.constant 0 : index
    %c0_14 = arith.constant 0 : index
    %c0_15 = arith.constant 0 : index
    %23 = vector.load %arg4[%c0_13, %c0_14, %c0_15] : memref<3x112x96xbf16, #tpu.memory_space<vmem>>, vector<1x112x96xbf16>
    %24 = vector.shape_cast %23 : vector<1x112x96xbf16> to vector<112x96xbf16>
    %cst_16 = arith.constant dense<0.000000e+00> : vector<28x96xf32>
    %25 = tpu.matmul %22, %24, %cst_16 {dimension_numbers = #tpu.dot_dimension_numbers<[1], [0], [0], [1], [0, 0, 1, 1], [], []>} : vector<28x112xbf16>, vector<112x96xbf16>, vector<28x96xf32> -> vector<28x96xf32>
    %26 = vector.extract_strided_slice %21 {offsets = [1, 0], sizes = [28, 112], strides = [1, 1]} : vector<30x112xbf16> to vector<28x112xbf16>
    %c1_17 = arith.constant 1 : index
    %c0_18 = arith.constant 0 : index
    %c0_19 = arith.constant 0 : index
    %27 = vector.load %arg4[%c1_17, %c0_18, %c0_19] : memref<3x112x96xbf16, #tpu.memory_space<vmem>>, vector<1x112x96xbf16>
    %28 = vector.shape_cast %27 : vector<1x112x96xbf16> to vector<112x96xbf16>
    %cst_20 = arith.constant dense<0.000000e+00> : vector<28x96xf32>
    %29 = tpu.matmul %26, %28, %cst_20 {dimension_numbers = #tpu.dot_dimension_numbers<[1], [0], [0], [1], [0, 0, 1, 1], [], []>} : vector<28x112xbf16>, vector<112x96xbf16>, vector<28x96xf32> -> vector<28x96xf32>
    %30 = arith.addf %25, %29 : vector<28x96xf32>
    %31 = vector.extract_strided_slice %21 {offsets = [2, 0], sizes = [28, 112], strides = [1, 1]} : vector<30x112xbf16> to vector<28x112xbf16>
    %c2_21 = arith.constant 2 : index
    %c0_22 = arith.constant 0 : index
    %c0_23 = arith.constant 0 : index
    %32 = vector.load %arg4[%c2_21, %c0_22, %c0_23] : memref<3x112x96xbf16, #tpu.memory_space<vmem>>, vector<1x112x96xbf16>
    %33 = vector.shape_cast %32 : vector<1x112x96xbf16> to vector<112x96xbf16>
    %cst_24 = arith.constant dense<0.000000e+00> : vector<28x96xf32>
    %34 = tpu.matmul %31, %33, %cst_24 {dimension_numbers = #tpu.dot_dimension_numbers<[1], [0], [0], [1], [0, 0, 1, 1], [], []>} : vector<28x112xbf16>, vector<112x96xbf16>, vector<28x96xf32> -> vector<28x96xf32>
    %35 = arith.addf %30, %34 : vector<28x96xf32>
    %c0_25 = arith.constant 0 : index
    %c0_26 = arith.constant 0 : index
    %36 = vector.load %arg5[%c0_25, %c0_26] : memref<1x96xf32, #tpu.memory_space<vmem>>, vector<1x96xf32>
    %37 = vector.broadcast %36 : vector<1x96xf32> to vector<28x96xf32>
    %38 = arith.addf %35, %37 : vector<28x96xf32>
    %cst_27 = arith.constant 0.000000e+00 : f32
    %39 = vector.broadcast %cst_27 : f32 to vector<28x96xf32>
    %40 = arith.maximumf %38, %39 : vector<28x96xf32>
    %41 = arith.truncf %40 : vector<28x96xf32> to vector<28x96xbf16>
    %42 = vector.extract_strided_slice %41 {offsets = [0, 0], sizes = [26, 96], strides = [1, 1]} : vector<28x96xbf16> to vector<26x96xbf16>
    %c0_28 = arith.constant 0 : index
    %c0_29 = arith.constant 0 : index
    %c0_30 = arith.constant 0 : index
    %43 = vector.load %arg6[%c0_28, %c0_29, %c0_30] : memref<3x96x80xbf16, #tpu.memory_space<vmem>>, vector<1x96x80xbf16>
    %44 = vector.shape_cast %43 : vector<1x96x80xbf16> to vector<96x80xbf16>
    %cst_31 = arith.constant dense<0.000000e+00> : vector<26x80xf32>
    %45 = tpu.matmul %42, %44, %cst_31 {dimension_numbers = #tpu.dot_dimension_numbers<[1], [0], [0], [1], [0, 0, 1, 1], [], []>} : vector<26x96xbf16>, vector<96x80xbf16>, vector<26x80xf32> -> vector<26x80xf32>
    %46 = vector.extract_strided_slice %41 {offsets = [1, 0], sizes = [26, 96], strides = [1, 1]} : vector<28x96xbf16> to vector<26x96xbf16>
    %c1_32 = arith.constant 1 : index
    %c0_33 = arith.constant 0 : index
    %c0_34 = arith.constant 0 : index
    %47 = vector.load %arg6[%c1_32, %c0_33, %c0_34] : memref<3x96x80xbf16, #tpu.memory_space<vmem>>, vector<1x96x80xbf16>
    %48 = vector.shape_cast %47 : vector<1x96x80xbf16> to vector<96x80xbf16>
    %cst_35 = arith.constant dense<0.000000e+00> : vector<26x80xf32>
    %49 = tpu.matmul %46, %48, %cst_35 {dimension_numbers = #tpu.dot_dimension_numbers<[1], [0], [0], [1], [0, 0, 1, 1], [], []>} : vector<26x96xbf16>, vector<96x80xbf16>, vector<26x80xf32> -> vector<26x80xf32>
    %50 = arith.addf %45, %49 : vector<26x80xf32>
    %51 = vector.extract_strided_slice %41 {offsets = [2, 0], sizes = [26, 96], strides = [1, 1]} : vector<28x96xbf16> to vector<26x96xbf16>
    %c2_36 = arith.constant 2 : index
    %c0_37 = arith.constant 0 : index
    %c0_38 = arith.constant 0 : index
    %52 = vector.load %arg6[%c2_36, %c0_37, %c0_38] : memref<3x96x80xbf16, #tpu.memory_space<vmem>>, vector<1x96x80xbf16>
    %53 = vector.shape_cast %52 : vector<1x96x80xbf16> to vector<96x80xbf16>
    %cst_39 = arith.constant dense<0.000000e+00> : vector<26x80xf32>
    %54 = tpu.matmul %51, %53, %cst_39 {dimension_numbers = #tpu.dot_dimension_numbers<[1], [0], [0], [1], [0, 0, 1, 1], [], []>} : vector<26x96xbf16>, vector<96x80xbf16>, vector<26x80xf32> -> vector<26x80xf32>
    %55 = arith.addf %50, %54 : vector<26x80xf32>
    %c0_40 = arith.constant 0 : index
    %c0_41 = arith.constant 0 : index
    %56 = vector.load %arg7[%c0_40, %c0_41] : memref<1x80xf32, #tpu.memory_space<vmem>>, vector<1x80xf32>
    %57 = vector.broadcast %56 : vector<1x80xf32> to vector<26x80xf32>
    %58 = arith.addf %55, %57 : vector<26x80xf32>
    %cst_42 = arith.constant 0.000000e+00 : f32
    %59 = vector.broadcast %cst_42 : f32 to vector<26x80xf32>
    %60 = arith.maximumf %58, %59 : vector<26x80xf32>
    %61 = vector.extract_strided_slice %60 {offsets = [0, 0], sizes = [1, 80], strides = [1, 1]} : vector<26x80xf32> to vector<1x80xf32>
    %c0_43 = arith.constant 0 : index
    %c0_44 = arith.constant 0 : index
    %62 = vector.load %arg19[%c0_43, %c0_44] : memref<2x800xf32, #tpu.memory_space<vmem>>, vector<1x80xf32>
    tpu.vector_store %arg19[%c0_43, %c0_44], %61 {strides = array<i32>} : memref<2x800xf32, #tpu.memory_space<vmem>>, vector<1x80xf32>,
    %63 = vector.extract_strided_slice %60 {offsets = [1, 0], sizes = [1, 80], strides = [1, 1]} : vector<26x80xf32> to vector<1x80xf32>
    %c0_45 = arith.constant 0 : index
    %c80 = arith.constant 80 : index
    %64 = vector.load %arg19[%c0_45, %c80] : memref<2x800xf32, #tpu.memory_space<vmem>>, vector<1x80xf32>
    tpu.vector_store %arg19[%c0_45, %c80], %63 {strides = array<i32>} : memref<2x800xf32, #tpu.memory_space<vmem>>, vector<1x80xf32>,
    %65 = vector.extract_strided_slice %60 {offsets = [2, 0], sizes = [1, 80], strides = [1, 1]} : vector<26x80xf32> to vector<1x80xf32>
    %c0_46 = arith.constant 0 : index
    %c160 = arith.constant 160 : index
    %66 = vector.load %arg19[%c0_46, %c160] : memref<2x800xf32, #tpu.memory_space<vmem>>, vector<1x80xf32>
    tpu.vector_store %arg19[%c0_46, %c160], %65 {strides = array<i32>} : memref<2x800xf32, #tpu.memory_space<vmem>>, vector<1x80xf32>,
    %67 = vector.extract_strided_slice %60 {offsets = [3, 0], sizes = [1, 80], strides = [1, 1]} : vector<26x80xf32> to vector<1x80xf32>
    %c0_47 = arith.constant 0 : index
    %c240 = arith.constant 240 : index
    %68 = vector.load %arg19[%c0_47, %c240] : memref<2x800xf32, #tpu.memory_space<vmem>>, vector<1x80xf32>
    tpu.vector_store %arg19[%c0_47, %c240], %67 {strides = array<i32>} : memref<2x800xf32, #tpu.memory_space<vmem>>, vector<1x80xf32>,
    %69 = vector.extract_strided_slice %60 {offsets = [4, 0], sizes = [1, 80], strides = [1, 1]} : vector<26x80xf32> to vector<1x80xf32>
    %c0_48 = arith.constant 0 : index
    %c320 = arith.constant 320 : index
    %70 = vector.load %arg19[%c0_48, %c320] : memref<2x800xf32, #tpu.memory_space<vmem>>, vector<1x80xf32>
    tpu.vector_store %arg19[%c0_48, %c320], %69 {strides = array<i32>} : memref<2x800xf32, #tpu.memory_space<vmem>>, vector<1x80xf32>,
    %71 = vector.extract_strided_slice %60 {offsets = [5, 0], sizes = [1, 80], strides = [1, 1]} : vector<26x80xf32> to vector<1x80xf32>
    %c0_49 = arith.constant 0 : index
    %c400 = arith.constant 400 : index
    %72 = vector.load %arg19[%c0_49, %c400] : memref<2x800xf32, #tpu.memory_space<vmem>>, vector<1x80xf32>
    tpu.vector_store %arg19[%c0_49, %c400], %71 {strides = array<i32>} : memref<2x800xf32, #tpu.memory_space<vmem>>, vector<1x80xf32>,
    %73 = vector.extract_strided_slice %60 {offsets = [6, 0], sizes = [1, 80], strides = [1, 1]} : vector<26x80xf32> to vector<1x80xf32>
    %c0_50 = arith.constant 0 : index
    %c480 = arith.constant 480 : index
    %74 = vector.load %arg19[%c0_50, %c480] : memref<2x800xf32, #tpu.memory_space<vmem>>, vector<1x80xf32>
    tpu.vector_store %arg19[%c0_50, %c480], %73 {strides = array<i32>} : memref<2x800xf32, #tpu.memory_space<vmem>>, vector<1x80xf32>,
    %75 = vector.extract_strided_slice %60 {offsets = [7, 0], sizes = [1, 80], strides = [1, 1]} : vector<26x80xf32> to vector<1x80xf32>
    %c0_51 = arith.constant 0 : index
    %c560 = arith.constant 560 : index
    %76 = vector.load %arg19[%c0_51, %c560] : memref<2x800xf32, #tpu.memory_space<vmem>>, vector<1x80xf32>
    tpu.vector_store %arg19[%c0_51, %c560], %75 {strides = array<i32>} : memref<2x800xf32, #tpu.memory_space<vmem>>, vector<1x80xf32>,
    %77 = vector.extract_strided_slice %60 {offsets = [8, 0], sizes = [1, 80], strides = [1, 1]} : vector<26x80xf32> to vector<1x80xf32>
    %c0_52 = arith.constant 0 : index
    %c640 = arith.constant 640 : index
    %78 = vector.load %arg19[%c0_52, %c640] : memref<2x800xf32, #tpu.memory_space<vmem>>, vector<1x80xf32>
    tpu.vector_store %arg19[%c0_52, %c640], %77 {strides = array<i32>} : memref<2x800xf32, #tpu.memory_space<vmem>>, vector<1x80xf32>,
    %79 = vector.extract_strided_slice %60 {offsets = [9, 0], sizes = [1, 80], strides = [1, 1]} : vector<26x80xf32> to vector<1x80xf32>
    %c0_53 = arith.constant 0 : index
    %c720 = arith.constant 720 : index
    %80 = vector.load %arg19[%c0_53, %c720] : memref<2x800xf32, #tpu.memory_space<vmem>>, vector<1x80xf32>
    tpu.vector_store %arg19[%c0_53, %c720], %79 {strides = array<i32>} : memref<2x800xf32, #tpu.memory_space<vmem>>, vector<1x80xf32>,
    %81 = vector.extract_strided_slice %60 {offsets = [16, 0], sizes = [1, 80], strides = [1, 1]} : vector<26x80xf32> to vector<1x80xf32>
    %c1_54 = arith.constant 1 : index
    %c0_55 = arith.constant 0 : index
    %82 = vector.load %arg19[%c1_54, %c0_55] : memref<2x800xf32, #tpu.memory_space<vmem>>, vector<1x80xf32>
    tpu.vector_store %arg19[%c1_54, %c0_55], %81 {strides = array<i32>} : memref<2x800xf32, #tpu.memory_space<vmem>>, vector<1x80xf32>,
    %83 = vector.extract_strided_slice %60 {offsets = [17, 0], sizes = [1, 80], strides = [1, 1]} : vector<26x80xf32> to vector<1x80xf32>
    %c1_56 = arith.constant 1 : index
    %c80_57 = arith.constant 80 : index
    %84 = vector.load %arg19[%c1_56, %c80_57] : memref<2x800xf32, #tpu.memory_space<vmem>>, vector<1x80xf32>
    tpu.vector_store %arg19[%c1_56, %c80_57], %83 {strides = array<i32>} : memref<2x800xf32, #tpu.memory_space<vmem>>, vector<1x80xf32>,
    %85 = vector.extract_strided_slice %60 {offsets = [18, 0], sizes = [1, 80], strides = [1, 1]} : vector<26x80xf32> to vector<1x80xf32>
    %c1_58 = arith.constant 1 : index
    %c160_59 = arith.constant 160 : index
    %86 = vector.load %arg19[%c1_58, %c160_59] : memref<2x800xf32, #tpu.memory_space<vmem>>, vector<1x80xf32>
    tpu.vector_store %arg19[%c1_58, %c160_59], %85 {strides = array<i32>} : memref<2x800xf32, #tpu.memory_space<vmem>>, vector<1x80xf32>,
    %87 = vector.extract_strided_slice %60 {offsets = [19, 0], sizes = [1, 80], strides = [1, 1]} : vector<26x80xf32> to vector<1x80xf32>
    %c1_60 = arith.constant 1 : index
    %c240_61 = arith.constant 240 : index
    %88 = vector.load %arg19[%c1_60, %c240_61] : memref<2x800xf32, #tpu.memory_space<vmem>>, vector<1x80xf32>
    tpu.vector_store %arg19[%c1_60, %c240_61], %87 {strides = array<i32>} : memref<2x800xf32, #tpu.memory_space<vmem>>, vector<1x80xf32>,
    %89 = vector.extract_strided_slice %60 {offsets = [20, 0], sizes = [1, 80], strides = [1, 1]} : vector<26x80xf32> to vector<1x80xf32>
    %c1_62 = arith.constant 1 : index
    %c320_63 = arith.constant 320 : index
    %90 = vector.load %arg19[%c1_62, %c320_63] : memref<2x800xf32, #tpu.memory_space<vmem>>, vector<1x80xf32>
    tpu.vector_store %arg19[%c1_62, %c320_63], %89 {strides = array<i32>} : memref<2x800xf32, #tpu.memory_space<vmem>>, vector<1x80xf32>,
    %91 = vector.extract_strided_slice %60 {offsets = [21, 0], sizes = [1, 80], strides = [1, 1]} : vector<26x80xf32> to vector<1x80xf32>
    %c1_64 = arith.constant 1 : index
    %c400_65 = arith.constant 400 : index
    %92 = vector.load %arg19[%c1_64, %c400_65] : memref<2x800xf32, #tpu.memory_space<vmem>>, vector<1x80xf32>
    tpu.vector_store %arg19[%c1_64, %c400_65], %91 {strides = array<i32>} : memref<2x800xf32, #tpu.memory_space<vmem>>, vector<1x80xf32>,
    %93 = vector.extract_strided_slice %60 {offsets = [22, 0], sizes = [1, 80], strides = [1, 1]} : vector<26x80xf32> to vector<1x80xf32>
    %c1_66 = arith.constant 1 : index
    %c480_67 = arith.constant 480 : index
    %94 = vector.load %arg19[%c1_66, %c480_67] : memref<2x800xf32, #tpu.memory_space<vmem>>, vector<1x80xf32>
    tpu.vector_store %arg19[%c1_66, %c480_67], %93 {strides = array<i32>} : memref<2x800xf32, #tpu.memory_space<vmem>>, vector<1x80xf32>,
    %95 = vector.extract_strided_slice %60 {offsets = [23, 0], sizes = [1, 80], strides = [1, 1]} : vector<26x80xf32> to vector<1x80xf32>
    %c1_68 = arith.constant 1 : index
    %c560_69 = arith.constant 560 : index
    %96 = vector.load %arg19[%c1_68, %c560_69] : memref<2x800xf32, #tpu.memory_space<vmem>>, vector<1x80xf32>
    tpu.vector_store %arg19[%c1_68, %c560_69], %95 {strides = array<i32>} : memref<2x800xf32, #tpu.memory_space<vmem>>, vector<1x80xf32>,
    %97 = vector.extract_strided_slice %60 {offsets = [24, 0], sizes = [1, 80], strides = [1, 1]} : vector<26x80xf32> to vector<1x80xf32>
    %c1_70 = arith.constant 1 : index
    %c640_71 = arith.constant 640 : index
    %98 = vector.load %arg19[%c1_70, %c640_71] : memref<2x800xf32, #tpu.memory_space<vmem>>, vector<1x80xf32>
    tpu.vector_store %arg19[%c1_70, %c640_71], %97 {strides = array<i32>} : memref<2x800xf32, #tpu.memory_space<vmem>>, vector<1x80xf32>,
    %99 = vector.extract_strided_slice %60 {offsets = [25, 0], sizes = [1, 80], strides = [1, 1]} : vector<26x80xf32> to vector<1x80xf32>
    %c1_72 = arith.constant 1 : index
    %c720_73 = arith.constant 720 : index
    %100 = vector.load %arg19[%c1_72, %c720_73] : memref<2x800xf32, #tpu.memory_space<vmem>>, vector<1x80xf32>
    tpu.vector_store %arg19[%c1_72, %c720_73], %99 {strides = array<i32>} : memref<2x800xf32, #tpu.memory_space<vmem>>, vector<1x80xf32>,
    tpu.wait_dma2 semaphore(%arg18 : memref<!tpu.dma_semaphore, #tpu.memory_space<semaphore_mem>>) src(%arg8 : memref<800x512xbf16, #tpu.memory_space<any>>) dst(%arg17 : memref<800x512xbf16, #tpu.memory_space<vmem>>)
    %c0_74 = arith.constant 0 : index
    %c0_75 = arith.constant 0 : index
    %101 = vector.load %arg19[%c0_74, %c0_75] : memref<2x800xf32, #tpu.memory_space<vmem>>, vector<2x800xf32>
    %102 = arith.truncf %101 : vector<2x800xf32> to vector<2x800xbf16>
    %c0_76 = arith.constant 0 : index
    %c0_77 = arith.constant 0 : index
    %103 = vector.load %arg17[%c0_76, %c0_77] : memref<800x512xbf16, #tpu.memory_space<vmem>>, vector<800x512xbf16>
    %cst_78 = arith.constant dense<0.000000e+00> : vector<2x512xf32>
    %104 = tpu.matmul %102, %103, %cst_78 {dimension_numbers = #tpu.dot_dimension_numbers<[1], [0], [0], [1], [0, 0, 1, 1], [], []>} : vector<2x800xbf16>, vector<800x512xbf16>, vector<2x512xf32> -> vector<2x512xf32>
    %c0_79 = arith.constant 0 : index
    %c0_80 = arith.constant 0 : index
    %105 = vector.load %arg9[%c0_79, %c0_80] : memref<1x512xf32, #tpu.memory_space<vmem>>, vector<1x512xf32>
    %106 = vector.broadcast %105 : vector<1x512xf32> to vector<2x512xf32>
    %107 = arith.addf %104, %106 : vector<2x512xf32>
    %cst_81 = arith.constant 0.000000e+00 : f32
    %108 = vector.broadcast %cst_81 : f32 to vector<2x512xf32>
    %109 = arith.maximumf %107, %108 : vector<2x512xf32>
    %110 = arith.truncf %109 : vector<2x512xf32> to vector<2x512xbf16>
    %c0_82 = arith.constant 0 : index
    %c0_83 = arith.constant 0 : index
    %111 = vector.load %arg10[%c0_82, %c0_83] : memref<512x128xbf16, #tpu.memory_space<vmem>>, vector<512x128xbf16>
    %cst_84 = arith.constant dense<0.000000e+00> : vector<2x128xf32>
    %112 = tpu.matmul %110, %111, %cst_84 {dimension_numbers = #tpu.dot_dimension_numbers<[1], [0], [0], [1], [0, 0, 1, 1], [], []>} : vector<2x512xbf16>, vector<512x128xbf16>, vector<2x128xf32> -> vector<2x128xf32>
    %c0_85 = arith.constant 0 : index
    %c0_86 = arith.constant 0 : index
    %113 = vector.load %arg11[%c0_85, %c0_86] : memref<1x128xf32, #tpu.memory_space<vmem>>, vector<1x128xf32>
    %114 = vector.broadcast %113 : vector<1x128xf32> to vector<2x128xf32>
    %115 = arith.addf %112, %114 : vector<2x128xf32>
    %cst_87 = arith.constant 0.000000e+00 : f32
    %116 = vector.broadcast %cst_87 : f32 to vector<2x128xf32>
    %117 = arith.maximumf %115, %116 : vector<2x128xf32>
    %118 = arith.truncf %117 : vector<2x128xf32> to vector<2x128xbf16>
    %c0_88 = arith.constant 0 : index
    %c0_89 = arith.constant 0 : index
    %119 = vector.load %arg12[%c0_88, %c0_89] : memref<128x64xbf16, #tpu.memory_space<vmem>>, vector<128x64xbf16>
    %cst_90 = arith.constant dense<0.000000e+00> : vector<2x64xf32>
    %120 = tpu.matmul %118, %119, %cst_90 {dimension_numbers = #tpu.dot_dimension_numbers<[1], [0], [0], [1], [0, 0, 1, 1], [], []>} : vector<2x128xbf16>, vector<128x64xbf16>, vector<2x64xf32> -> vector<2x64xf32>
    %c0_91 = arith.constant 0 : index
    %c0_92 = arith.constant 0 : index
    %121 = vector.load %arg13[%c0_91, %c0_92] : memref<1x64xf32, #tpu.memory_space<vmem>>, vector<1x64xf32>
    %122 = vector.broadcast %121 : vector<1x64xf32> to vector<2x64xf32>
    %123 = arith.addf %120, %122 : vector<2x64xf32>
    %cst_93 = arith.constant 0.000000e+00 : f32
    %124 = vector.broadcast %cst_93 : f32 to vector<2x64xf32>
    %125 = arith.maximumf %123, %124 : vector<2x64xf32>
    %126 = arith.truncf %125 : vector<2x64xf32> to vector<2x64xbf16>
    %c0_94 = arith.constant 0 : index
    %c0_95 = arith.constant 0 : index
    %127 = vector.load %arg14[%c0_94, %c0_95] : memref<64x6xbf16, #tpu.memory_space<vmem>>, vector<64x6xbf16>
    %cst_96 = arith.constant dense<0.000000e+00> : vector<2x6xf32>
    %128 = tpu.matmul %126, %127, %cst_96 {dimension_numbers = #tpu.dot_dimension_numbers<[1], [0], [0], [1], [0, 0, 1, 1], [], []>} : vector<2x64xbf16>, vector<64x6xbf16>, vector<2x6xf32> -> vector<2x6xf32>
    %c0_97 = arith.constant 0 : index
    %c0_98 = arith.constant 0 : index
    %129 = vector.load %arg15[%c0_97, %c0_98] : memref<1x6xf32, #tpu.memory_space<vmem>>, vector<1x6xf32>
    %130 = vector.broadcast %129 : vector<1x6xf32> to vector<2x6xf32>
    %131 = arith.addf %128, %130 : vector<2x6xf32>
    %c0_99 = arith.constant 0 : index
    %c0_100 = arith.constant 0 : index
    %132 = vector.load %arg16[%c0_99, %c0_100] : memref<2x6xf32, #tpu.memory_space<vmem>>, vector<2x6xf32>
    tpu.vector_store %arg16[%c0_99, %c0_100], %131 {strides = array<i32>} : memref<2x6xf32, #tpu.memory_space<vmem>>, vector<2x6xf32>,
    return
  }
  func.func @transform_0(%arg0: i32) -> (i32, i32) {
    %c0_i32 = arith.constant 0 : i32
    %c0_i32_0 = arith.constant 0 : i32
    %c0_i32_1 = arith.constant 0 : i32
    return %c0_i32, %c0_i32_0 : i32, i32
  }
  func.func @transform_1(%arg0: i32) -> (i32, i32, i32) {
    %c0_i32 = arith.constant 0 : i32
    %c0_i32_0 = arith.constant 0 : i32
    %c0_i32_1 = arith.constant 0 : i32
    %c0_i32_2 = arith.constant 0 : i32
    return %c0_i32, %c0_i32_0, %c0_i32_1 : i32, i32, i32
  }
  func.func @transform_2(%arg0: i32) -> (i32, i32) {
    %c0_i32 = arith.constant 0 : i32
    %c0_i32_0 = arith.constant 0 : i32
    %c0_i32_1 = arith.constant 0 : i32
    return %c0_i32, %c0_i32_0 : i32, i32
  }
  func.func @transform_3(%arg0: i32) -> (i32, i32, i32) {
    %c0_i32 = arith.constant 0 : i32
    %c0_i32_0 = arith.constant 0 : i32
    %c0_i32_1 = arith.constant 0 : i32
    %c0_i32_2 = arith.constant 0 : i32
    return %c0_i32, %c0_i32_0, %c0_i32_1 : i32, i32, i32
  }
  func.func @transform_4(%arg0: i32) -> (i32, i32) {
    %c0_i32 = arith.constant 0 : i32
    %c0_i32_0 = arith.constant 0 : i32
    %c0_i32_1 = arith.constant 0 : i32
    return %c0_i32, %c0_i32_0 : i32, i32
  }
  func.func @transform_5(%arg0: i32) -> (i32, i32, i32) {
    %c0_i32 = arith.constant 0 : i32
    %c0_i32_0 = arith.constant 0 : i32
    %c0_i32_1 = arith.constant 0 : i32
    %c0_i32_2 = arith.constant 0 : i32
    return %c0_i32, %c0_i32_0, %c0_i32_1 : i32, i32, i32
  }
  func.func @transform_6(%arg0: i32) -> (i32, i32) {
    %c0_i32 = arith.constant 0 : i32
    %c0_i32_0 = arith.constant 0 : i32
    %c0_i32_1 = arith.constant 0 : i32
    return %c0_i32, %c0_i32_0 : i32, i32
  }
  func.func @transform_8(%arg0: i32) -> (i32, i32) {
    %c0_i32 = arith.constant 0 : i32
    %c0_i32_0 = arith.constant 0 : i32
    %c0_i32_1 = arith.constant 0 : i32
    return %c0_i32, %c0_i32_0 : i32, i32
  }
  func.func @transform_9(%arg0: i32) -> (i32, i32) {
    %c0_i32 = arith.constant 0 : i32
    %c0_i32_0 = arith.constant 0 : i32
    %c0_i32_1 = arith.constant 0 : i32
    return %c0_i32, %c0_i32_0 : i32, i32
  }
  func.func @transform_10(%arg0: i32) -> (i32, i32) {
    %c0_i32 = arith.constant 0 : i32
    %c0_i32_0 = arith.constant 0 : i32
    %c0_i32_1 = arith.constant 0 : i32
    return %c0_i32, %c0_i32_0 : i32, i32
  }
  func.func @transform_11(%arg0: i32) -> (i32, i32) {
    %c0_i32 = arith.constant 0 : i32
    %c0_i32_0 = arith.constant 0 : i32
    %c0_i32_1 = arith.constant 0 : i32
    return %c0_i32, %c0_i32_0 : i32, i32
  }
  func.func @transform_12(%arg0: i32) -> (i32, i32) {
    %c0_i32 = arith.constant 0 : i32
    %c0_i32_0 = arith.constant 0 : i32
    %c0_i32_1 = arith.constant 0 : i32
    return %c0_i32, %c0_i32_0 : i32, i32
  }
  func.func @transform_13(%arg0: i32) -> (i32, i32) {
    %c0_i32 = arith.constant 0 : i32
    %c0_i32_0 = arith.constant 0 : i32
    %c0_i32_1 = arith.constant 0 : i32
    return %c0_i32, %c0_i32_0 : i32, i32
  }
  func.func @transform_14(%arg0: i32) -> (i32, i32) {
    %c0_i32 = arith.constant 0 : i32
    %c0_i32_0 = arith.constant 0 : i32
    %c0_i32_1 = arith.constant 0 : i32
    return %c0_i32, %c0_i32_0 : i32, i32
  }
  func.func @transform_15(%arg0: i32) -> (i32, i32) {
    %c0_i32 = arith.constant 0 : i32
    %c0_i32_0 = arith.constant 0 : i32
    %c0_i32_1 = arith.constant 0 : i32
    return %c0_i32, %c0_i32_0 : i32, i32
  }
}

</mosaic_0001>

<bundles_post_ra>
// kernel: fused_forward.1
= control target key start
LH: loop header
LB: loop body
LE: loop exit
PB: predicated region body
PF: predicated region fallthrough
CT: control target
= control target key end

     0   :  { %20 = vsyncpa [#allocation6], 0  ;;  %s54_s18 = sld [smem:[#allocation0]]   ;;  %s3169_s19 = smov [#allocation2]   ;;  %vm108_vm0 = vsmask.f32 7424  ;;  %s3730_s0 = inlined_call_operand.vmem [shape: f32[32,64], index: 0, kind: input, shape index: {}]   ;;  %s3731_s1 = inlined_call_operand.vmem [shape: bf16[3,64,112], index: 1, kind: input, shape index: {}]   ;;  %s3732_s2 = inlined_call_operand.vmem [shape: f32[1,112], index: 2, kind: input, shape index: {}]   ;;  %s3733_s3 = inlined_call_operand.vmem [shape: bf16[3,112,96], index: 3, kind: input, shape index: {}]   ;;  %s3734_s4 = inlined_call_operand.vmem [shape: f32[1,96], index: 4, kind: input, shape index: {}]   ;;  %s3735_s5 = inlined_call_operand.vmem [shape: bf16[3,96,80], index: 5, kind: input, shape index: {}]   ;;  %s3736_s6 = inlined_call_operand.vmem [shape: f32[1,80], index: 6, kind: input, shape index: {}]   ;;  %s3737_s7 = inlined_call_operand.hbm [shape: bf16[800,512], index: 7, kind: input, shape index: {}]   ;;  %s3738_s8 = inlined_call_operand.vmem [shape: f32[1,512], index: 8, kind: input, shape index: {}]   ;;  %s3739_s9 = inlined_call_operand.vmem [shape: bf16[512,128], index: 9, kind: input, shape index: {}]   ;;  %s3740_s10 = inlined_call_operand.vmem [shape: f32[1,128], index: 10, kind: input, shape index: {}]   ;;  %s3741_s11 = inlined_call_operand.vmem [shape: bf16[128,64], index: 11, kind: input, shape index: {}]   ;;  %s3742_s12 = inlined_call_operand.vmem [shape: f32[1,64], index: 12, kind: input, shape index: {}]   ;;  %s3743_s13 = inlined_call_operand.vmem [shape: bf16[64,6], index: 13, kind: input, shape index: {}]   ;;  %s3744_s14 = inlined_call_operand.vmem [shape: f32[1,6], index: 14, kind: input, shape index: {}]   ;;  %s3745_s15 = inlined_call_operand.hbm [shape: f32[2,6], index: 15, kind: output, shape index: {}]  }
   0x1   :  { %s62_s20 = sshll.u32 %s3169_s19, 4  ;;  %s3170_s21 = smov 512   ;;  %vm148_vm1 = vcmask 523264   ;;  %vm292_vm2 = vcmask 1046528   ;;  %vm482_vm3 = vcmask 916480   ;;  %vm847_vm4 = vcmask 785408   ;;  %s63_s20 = int_to_ptr.vmem [resolvable:$true] %s62_s20 }
   0x2   :  { %66 = sst [smem:[#allocation8]] %s3170_s21  ;;  %s3171_s22 = smov 4   ;;  %vm1120_vm5 = vcmask 647168   ;;  %vm1138_vm6 = vcmask 1041024   ;;  %vm1139_vm7 = vcmask 256002   ;;  %vm1135_vm8 = vcmask 654336  }
   0x3   :  { %68 = sst [smem:[#allocation8 + $0x1]] %s3170_s21  ;;  %s3172_s23 = smov 64   ;;  %vm3489_vm9 = vmor %vm1139_vm7, %vm1138_vm6  ;;  %vm1146_vm10 = vcmask 909568   ;;  %vm1155_vm11 = vcmask 1041280   ;;  %vm1156_vm12 = vcmask 518146   ;;  %vm1172_vm13 = vcmask 1040896  }
   0x4   :  { %70 = sst [smem:[#allocation8 + $0x2]] %s3171_s22  ;;  %s3173_s25 = smov 128   ;;  %vm1173_vm14 = vcmask 124930   ;;  %vm3500_vm15 = vmor %vm1156_vm12, %vm1155_vm11  ;;  %vm1181_vm6 = vcmask 778368  }
   0x5   :  { %72 = sst [smem:[#allocation8 + $0x3]] %s3172_s23  ;;  %s3174_s27 = smov 2  }
   0x6   :  { %s2476_s24 = sshll.u32 %s54_s18, 26  ;;  %74 = sst [smem:[#allocation8 + $0x4]] %s3173_s25 }
   0x7   :  { %s2477_s26 = sadd.s32 134217728, %s2476_s24  ;;  %76 = sst [smem:[#allocation8 + $0x5]] %s3174_s27 }
   0x8   :  { %s3175_s28 = smov 256   ;;  %80 = sst [smem:[#allocation8 + $0x7]] %s3172_s23 }
   0x9   :  { %78 = sst [smem:[#allocation8 + $0x6]] %s3175_s28  ;;  %s3176_s29 = smov [#allocation3]  }
   0xa   :  { %82 = sst [smem:[#allocation8 + $0x8]] %s3171_s22  ;;  %s3177_s30 = smov [#allocation7]  }
   0xb   :  { %84 = dma.general %s3737_s7, 25600, %s63_s20, %s3176_s29, %s3177_s30, [#allocation8], %s2477_s26, 0  }
   0xc   :  { %v3046_v0 = vld [vmem:[%s3731_s1 + $0x20] sm:$0xff]   ;;  %v3047_v1 = vld [vmem:[%s3731_s1 + $0x28] sm:$0xff]   ;;  %v3048_v2 = vld [vmem:[%s3731_s1 + $0x30] sm:$0xff]   ;;  %s3181_s7 = smov 112   ;;  %s3182_s20 = smov 96  }
   0xd   :  { %2806 = vmatprep.subr.bf16.mxu0 %v3046_v0  ;;  %v85_v3 = vld [vmem:[%s3730_s0] sm:$0xff]  ;;  %v86_v4 = vld [vmem:[%s3730_s0 + $0x8] sm:$0xff]  ;;  %v87_v5 = vld [vmem:[%s3730_s0 + $0x10] sm:$0xff]  ;;  %s3184_s26 = smov 48  }
   0xe   :  { %2807 = vmatpush3.bf16.msra.mxu0 %v3046_v0  ;;  %v88_v6 = vld [vmem:[%s3730_s0 + $0x18] sm:$0xff]  ;;  %v89_v7 = vpack.c.bf16 %v86_v4, %v85_v3  ;;  %v3050_v17 = vld [vmem:[%s3731_s1] sm:$0xff]   ;;  %v3051_v20 = vld [vmem:[%s3731_s1 + $0x8] sm:$0xff]  }
   0xf   :  { %2808 = vmatprep.subr.bf16.mxu0 %v3047_v1  ;;  %v90_v8 = vpack.c.bf16 %v88_v6, %v87_v5  ;;  %v3049_v11 = vld [vmem:[%s3731_s1 + $0x38] sm:$0xff]   ;;  %v3059_v23 = vld [vmem:[%s3733_s3 + $0x40] sm:$0xff]   ;;  %v3060_v25 = vld [vmem:[%s3733_s3 + $0x48] sm:$0xff]  }
  0x10   :  { %v110_v9 = vshrl.u32 %v89_v7, 16  ;;  %v112_v10 = vshll.u32 %v89_v7, 16  ;;  %v3058_v21 = vld [vmem:[%s3733_s3 + $0x38] sm:$0xff]   ;;  %v293_v22 = vrot.slane %v89_v7, 1  ;;  %v3052_v26 = vld [vmem:[%s3731_s1 + $0x10] sm:$0xff]   ;;  %v3054_v28 = vld [vmem:[%s3731_s1 + $0x40] sm:$0xff]  }
  0x11   :  { %v117_v12 = vshll.u32 %v90_v8, 16  ;;  %v121_v15 = vshrl.u32 %v90_v8, 16  ;;  %v294_v24 = vrot.slane %v90_v8, 1  ;;  %2842 = vmatprep.subr.bf16.mxu1 %v3058_v21  ;;  %v3053_v27 = vld [vmem:[%s3731_s1 + $0x18] sm:$0xff]   ;;  %v3055_v29 = vld [vmem:[%s3731_s1 + $0x48] sm:$0xff]   ;;  %v3056_v31 = vld [vmem:[%s3731_s1 + $0x50] sm:$0xff]  }
  0x12   :  { %2809 = vmatpush3.bf16.msra.mxu0 %v3047_v1  ;;  %v114_v13 = vrot.slane %v112_v10, 1  ;;  %2843 = vmatpush3.bf16.msra.mxu1 %v3058_v21  ;;  %v3057_v32 = vld [vmem:[%s3731_s1 + $0x58] sm:$0xff]   ;;  %v3061_v33 = vld [vmem:[%s3733_s3 + $0x50] sm:$0xff]   ;;  %v3063_v35 = vld [vmem:[%s3733_s3 + $0x60] sm:$0xff]  }
  0x13   :  { %2810 = vmatprep.subr.bf16.mxu0 %v3048_v2  ;;  %v119_v14 = vrot.slane %v117_v12, 1  ;;  %2844 = vmatprep.subr.bf16.mxu1 %v3059_v23  ;;  %v295_v30 = vsel %vm292_vm2, %v293_v22, %v294_v24  ;;  %v3062_v34 = vld [vmem:[%s3733_s3 + $0x58] sm:$0xff]   ;;  %v3064_v36 = vld [vmem:[%s3733_s3 + $0x68] sm:$0xff]   ;;  %v3065_v37 = vld [vmem:[%s3733_s3] sm:$0xff]  }
  0x14   :  { %v115_v16 = vor.u32 %v114_v13, %v110_v9  ;;  %v3079_v38 = vld [vmem:[%s3735_s5 + $0x30] sm:$0xff]   ;;  %v3080_v39 = vld [vmem:[%s3735_s5 + $0x38] sm:$0xff]   ;;  %v2512_v40 = vld [vmem:[%s3732_s2] ss:$0 sm:$0xff] }
  0x15   :  { %v123_v19 = vor.u32 %v121_v15, %v119_v14  ;;  %v3066_v3 = vld [vmem:[%s3733_s3 + $0x8] sm:$0xff]   ;;  %v3067_v4 = vld [vmem:[%s3733_s3 + $0x10] sm:$0xff]   ;;  %v3068_v5 = vld [vmem:[%s3733_s3 + $0x18] sm:$0xff]  }
  0x16   :  { %2811 = vmatpush3.bf16.msra.mxu0 %v3048_v2  ;;  %v120_v18 = vsel %vm108_vm0, %v115_v16, %v119_v14  ;;  %2845 = vmatpush3.bf16.msra.mxu1 %v3059_v23  ;;  %v3069_v6 = vld [vmem:[%s3733_s3 + $0x20] sm:$0xff]   ;;  %v3072_v9 = vld [vmem:[%s3733_s3 + $0x70] sm:$0xff]   ;;  %v3073_v10 = vld [vmem:[%s3733_s3 + $0x78] sm:$0xff]  }
  0x17   :  { %2812 = vmatprep.subr.bf16.mxu0 %v3049_v11  ;;  %2814 = vmatprep.mubr.msk.bf16.mxu0 %vm148_vm1, %v120_v18  ;;  %v3075_v12 = vld [vmem:[%s3733_s3 + $0x88] sm:$0xff]   ;;  %v3076_v13 = vld [vmem:[%s3733_s3 + $0x90] sm:$0xff]   ;;  %v3077_v14 = vld [vmem:[%s3733_s3 + $0x98] sm:$0xff]  }
  0x18   :  { %2846 = vmatprep.subr.bf16.mxu1 %v3060_v25  ;;  %v3078_v15 = vld [vmem:[%s3733_s3 + $0xa0] sm:$0xff]   ;;  %v3083_v18 = vld [vmem:[%s3735_s5 + $0x50] sm:$0xff]  }
  0x19   :  { %v3081_v16 = vld [vmem:[%s3735_s5 + $0x40] sm:$0xff]  }
  0x1a   :  { %2813 = vmatpush3.bf16.msra.mxu0 %v3049_v11  ;;  %2847 = vmatpush3.bf16.msra.mxu1 %v3060_v25  ;;  %v3074_v11 = vld [vmem:[%s3733_s3 + $0x80] sm:$0xff]  }
  0x1b   :  { %2818 = vmatprep.subr.bf16.mxu0 %v3050_v17  ;;  %2848 = vmatprep.subr.bf16.mxu1 %v3061_v33  ;;  %v2568_v21 = vld [vmem:[%s3734_s4] ss:$0 sm:$0xff] }
  0x1d   :  { %2815 = vmatmul.mubr.msk.bf16.vlgmr.msra.gmra.mrb[0].mxu0 %vm148_vm1, %v123_v19  ;;  %v3084_v19 = vld [vmem:[%s3735_s5 + $0x58] sm:$0xff]  }
  0x1e   :  { %2819 = vmatpush3.bf16.msra.mxu0 %v3050_v17  ;;  %2826 = vmatprep.mubr.msk.bf16.mxu0 %vm148_vm1, %v89_v7  ;;  %v3070_v7 = vld [vmem:[%s3733_s3 + $0x28] sm:$0xff]  }
  0x1f   :  { %2820 = vmatprep.subr.bf16.mxu0 %v3051_v20  ;;  %2849 = vmatpush3.bf16.msra.mxu1 %v3061_v33  ;;  %v3082_v17 = vld [vmem:[%s3735_s5 + $0x48] sm:$0xff]  }
  0x20   :  { %2850 = vmatprep.subr.bf16.mxu1 %v3062_v34 }
  0x22   :  { %2821 = vmatpush3.bf16.msra.mxu0 %v3051_v20  ;;  %v3085_v20 = vld [vmem:[%s3735_s5] sm:$0xff]  }
  0x23   :  { %2822 = vmatprep.subr.bf16.mxu0 %v3052_v26  ;;  %2851 = vmatpush3.bf16.msra.mxu1 %v3062_v34 }
  0x24   :  { %2852 = vmatprep.subr.bf16.mxu1 %v3063_v35 }
  0x26   :  { %2823 = vmatpush3.bf16.msra.mxu0 %v3052_v26 }
  0x27   :  { %2824 = vmatprep.subr.bf16.mxu0 %v3053_v27  ;;  %2853 = vmatpush3.bf16.msra.mxu1 %v3063_v35 }
  0x28   :  { %2854 = vmatprep.subr.bf16.mxu1 %v3064_v36 }
  0x2a   :  { %2825 = vmatpush3.bf16.msra.mxu0 %v3053_v27 }
  0x2b   :  { %2830 = vmatprep.subr.bf16.mxu0 %v3054_v28  ;;  %2855 = vmatpush3.bf16.msra.mxu1 %v3064_v36 }
  0x2c   :  { %2860 = vmatprep.subr.bf16.mxu1 %v3065_v37 }
  0x2d   :  { %2827 = vmatmul.mubr.msk.bf16.vlgmr.msra.gmra.mrb[0].mxu0 %vm148_vm1, %v90_v8  ;;  %v3071_v8 = vld [vmem:[%s3733_s3 + $0x30] sm:$0xff]  }
  0x2e   :  { %2831 = vmatpush3.bf16.msra.mxu0 %v3054_v28  ;;  %2838 = vmatprep.mubr.msk.bf16.mxu0 %vm148_vm1, %v295_v30 }
  0x2f   :  { %2832 = vmatprep.subr.bf16.mxu0 %v3055_v29 }
  0x32   :  { %2833 = vmatpush3.bf16.msra.mxu0 %v3055_v29 }
  0x33   :  { %2834 = vmatprep.subr.bf16.mxu0 %v3056_v31 }
  0x36   :  { %2835 = vmatpush3.bf16.msra.mxu0 %v3056_v31 }
  0x37   :  { %2836 = vmatprep.subr.bf16.mxu0 %v3057_v32 }
  0x3a   :  { %2837 = vmatpush3.bf16.msra.mxu0 %v3057_v32 }
  0x3b   :  { %2896 = vmatprep.subr.bf16.mxu0 %v3079_v38 }
  0x3d   :  { %2839 = vmatmul.mubr.msk.bf16.vlgmr.msra.gmra.mrb[0].mxu0 %vm148_vm1, %v294_v24 }
  0x3e   :  { %2897 = vmatpush3.bf16.msra.mxu0 %v3079_v38 }
  0x3f   :  { %2898 = vmatprep.subr.bf16.mxu0 %v3080_v39 }
  0x42   :  { %2899 = vmatpush3.bf16.msra.mxu0 %v3080_v39 }
  0x43   :  { %2900 = vmatprep.subr.bf16.mxu0 %v3081_v16 }
  0x46   :  { %2901 = vmatpush3.bf16.msra.mxu0 %v3081_v16 }
  0x47   :  { %2902 = vmatprep.subr.bf16.mxu0 %v3082_v17 }
  0x4a   :  { %2903 = vmatpush3.bf16.msra.mxu0 %v3082_v17 }
  0x4b   :  { %2904 = vmatprep.subr.bf16.mxu0 %v3083_v18 }
  0x4e   :  { %2905 = vmatpush3.bf16.msra.mxu0 %v3083_v18 }
  0x4f   :  { %2906 = vmatprep.subr.bf16.mxu0 %v3084_v19 }
  0x52   :  { %2907 = vmatpush3.bf16.msra.mxu0 %v3084_v19 }
  0x53   :  { %2912 = vmatprep.subr.bf16.mxu0 %v3085_v20 }
 0x110   :  { %v2840_v41 = vpop.f32.mrb[0].mxu0 }
 0x111   :  { %v388_v42 = vadd.f32 %v2840_v41, %v2512_v40  ;;  %v360_v43 = vpop.f32.mrb[1].mxu0 }
 0x112   :  { %v386_v44 = vadd.f32 %v2512_v40, %v360_v43  ;;  %v2841_v45 = vpop.f32.mrb[2].mxu0 }
 0x113   :  { %v389_v46 = vadd.f32 %v2841_v45, %v2512_v40  ;;  %v363_v47 = vpop.f32.mrb[3].mxu0  ;;  %v392_v49 = vmax.f32 %v388_v42, 0.0 }
 0x114   :  { %v387_v48 = vadd.f32 %v2512_v40, %v363_v47  ;;  %v390_v51 = vmax.f32 %v386_v44, 0.0 }
 0x115   :  { %v393_v50 = vmax.f32 %v389_v46, 0.0 }
 0x116   :  { %v391_v52 = vmax.f32 %v387_v48, 0.0  ;;  %v3086_v48 = vld [vmem:[%s3735_s5 + $0x8] sm:$0xff]  }
 0x117   :  { %v395_v53 = vpack.c.bf16 %v393_v50, %v392_v49  ;;  %v3087_v49 = vld [vmem:[%s3735_s5 + $0x10] sm:$0xff]   ;;  %v3088_v50 = vld [vmem:[%s3735_s5 + $0x18] sm:$0xff]  }
 0x118   :  { %v394_v54 = vpack.c.bf16 %v391_v52, %v390_v51  ;;  %v3089_v51 = vld [vmem:[%s3735_s5 + $0x20] sm:$0xff]   ;;  %v3090_v52 = vld [vmem:[%s3735_s5 + $0x28] sm:$0xff]  }
 0x119   :  { %v433_v55 = vshll.u32 %v395_v53, 16  ;;  %v651_v56 = vrot.slane %v395_v53, 1  ;;  %v437_v0 = vshrl.u32 %v395_v53, 16 }
 0x11a   :  { %v428_v57 = vshll.u32 %v394_v54, 16  ;;  %v650_v58 = vrot.slane %v394_v54, 1  ;;  %v426_v59 = vshrl.u32 %v394_v54, 16 }
 0x11b   :  { %v435_v61 = vrot.slane %v433_v55, 1  ;;  %v3093_v55 = vld [vmem:[%s3735_s5 + $0x70] sm:$0xff]  }
 0x11c   :  { %v430_v60 = vrot.slane %v428_v57, 1  ;;  %v652_v62 = vsel %vm292_vm2, %v650_v58, %v651_v56  ;;  %v3095_v57 = vld [vmem:[%s3735_s5 + $0x80] sm:$0xff]   ;;  %v3096_v58 = vld [vmem:[%s3735_s5 + $0x88] sm:$0xff]  }
 0x11d   :  { %v439_v2 = vor.u32 %v437_v0, %v435_v61  ;;  %v2617_v0 = vld [vmem:[%s3736_s6] ss:$0 sm:$0xff]  ;;  %s3180_s6 = smov 32  }
 0x11e   :  { %v431_v63 = vor.u32 %v430_v60, %v426_v59  ;;  %v3178_v59 = vmov 1983009808  }
 0x11f   :  { %v1124_v60 = vunpack.c.l.s4 %v3178_v59 }
 0x120   :  { %v436_v1 = vsel %vm108_vm0, %v431_v63, %v435_v61  ;;  %v1126_v61 = vlaneseq }
 0x121   :  { %2856 = vmatprep.mubr.msk.bf16.mxu1 %vm482_vm3, %v436_v1 }
 0x122   :  { %2857 = vmatmul.mubr.msk.bf16.vlgmr.msra.gmra.mrb[0].mxu1 %vm482_vm3, %v439_v2  ;;  %v3469_v63 = vshrl.u32 %v1126_v61, 7 }
 0x123   :  { %2861 = vmatpush3.bf16.msra.mxu1 %v3065_v37  ;;  %2874 = vmatprep.mubr.msk.bf16.mxu1 %vm482_vm3, %v394_v54  ;;  %v3092_v54 = vld [vmem:[%s3735_s5 + $0x68] sm:$0xff]  }
 0x124   :  { %2862 = vmatprep.subr.bf16.mxu1 %v3066_v3 }
 0x127   :  { %2863 = vmatpush3.bf16.msra.mxu1 %v3066_v3 }
 0x128   :  { %2864 = vmatprep.subr.bf16.mxu1 %v3067_v4 }
 0x12b   :  { %2865 = vmatpush3.bf16.msra.mxu1 %v3067_v4 }
 0x12c   :  { %2866 = vmatprep.subr.bf16.mxu1 %v3068_v5 }
 0x12f   :  { %2867 = vmatpush3.bf16.msra.mxu1 %v3068_v5 }
 0x130   :  { %2868 = vmatprep.subr.bf16.mxu1 %v3069_v6 }
 0x133   :  { %2869 = vmatpush3.bf16.msra.mxu1 %v3069_v6 }
 0x134   :  { %2870 = vmatprep.subr.bf16.mxu1 %v3070_v7 }
 0x137   :  { %2871 = vmatpush3.bf16.msra.mxu1 %v3070_v7 }
 0x138   :  { %2872 = vmatprep.subr.bf16.mxu1 %v3071_v8 }
 0x13b   :  { %2873 = vmatpush3.bf16.msra.mxu1 %v3071_v8 }
 0x13c   :  { %2878 = vmatprep.subr.bf16.mxu1 %v3072_v9 }
 0x13e   :  { %2875 = vmatmul.mubr.msk.bf16.vlgmr.msra.gmra.mrb[0].mxu1 %vm482_vm3, %v395_v53  ;;  %v3091_v53 = vld [vmem:[%s3735_s5 + $0x60] sm:$0xff]  }
 0x13f   :  { %2879 = vmatpush3.bf16.msra.mxu1 %v3072_v9  ;;  %2892 = vmatprep.mubr.msk.bf16.mxu1 %vm482_vm3, %v652_v62  ;;  %v1125_v62 = vunpack.c.0.s8 %v1124_v60 }
 0x140   :  { %2880 = vmatprep.subr.bf16.mxu1 %v3073_v10 }
 0x141   :  { %v3475_v4 = vsub.s32 %v1125_v62, %v3469_v63 }
 0x143   :  { %2881 = vmatpush3.bf16.msra.mxu1 %v3073_v10 }
 0x144   :  { %2882 = vmatprep.subr.bf16.mxu1 %v3074_v11 }
 0x147   :  { %2883 = vmatpush3.bf16.msra.mxu1 %v3074_v11 }
 0x148   :  { %2884 = vmatprep.subr.bf16.mxu1 %v3075_v12 }
 0x14b   :  { %2885 = vmatpush3.bf16.msra.mxu1 %v3075_v12 }
 0x14c   :  { %2886 = vmatprep.subr.bf16.mxu1 %v3076_v13 }
 0x14f   :  { %2887 = vmatpush3.bf16.msra.mxu1 %v3076_v13 }
 0x150   :  { %2888 = vmatprep.subr.bf16.mxu1 %v3077_v14 }
 0x153   :  { %2889 = vmatpush3.bf16.msra.mxu1 %v3077_v14 }
 0x154   :  { %2890 = vmatprep.subr.bf16.mxu1 %v3078_v15 }
 0x157   :  { %2891 = vmatpush3.bf16.msra.mxu1 %v3078_v15 }
 0x15a   :  { %2893 = vmatmul.mubr.msk.bf16.vlgmr.msra.gmra.mrb[0].mxu1 %vm482_vm3, %v651_v56  ;;  %v3094_v56 = vld [vmem:[%s3735_s5 + $0x78] sm:$0xff]   ;;  %s3179_s5 = smov 80  }
 0x22d   :  { %v2894_v22 = vpop.f32.mrb[0].mxu1 }
 0x22e   :  { %v763_v23 = vadd.f32 %v2894_v22, %v2568_v21  ;;  %v735_v24 = vpop.f32.mrb[1].mxu1 }
 0x22f   :  { %v761_v25 = vadd.f32 %v2568_v21, %v735_v24  ;;  %v2895_v26 = vpop.f32.mrb[2].mxu1 }
 0x230   :  { %v764_v27 = vadd.f32 %v2895_v26, %v2568_v21  ;;  %v738_v28 = vpop.f32.mrb[3].mxu1  ;;  %v767_v30 = vmax.f32 %v763_v23, 0.0 }
 0x231   :  { %v762_v29 = vadd.f32 %v2568_v21, %v738_v28  ;;  %v765_v32 = vmax.f32 %v761_v25, 0.0 }
 0x232   :  { %v768_v31 = vmax.f32 %v764_v27, 0.0 }
 0x233   :  { %v766_v33 = vmax.f32 %v762_v29, 0.0 }
 0x234   :  { %v770_v34 = vpack.c.bf16 %v768_v31, %v767_v30 }
 0x235   :  { %v769_v35 = vpack.c.bf16 %v766_v33, %v765_v32 }
 0x236   :  { %v804_v36 = vshll.u32 %v770_v34, 16  ;;  %v1008_v37 = vrot.slane %v770_v34, 1  ;;  %v808_v44 = vshrl.u32 %v770_v34, 16 }
 0x237   :  { %v799_v38 = vshll.u32 %v769_v35, 16  ;;  %v1007_v39 = vrot.slane %v769_v35, 1  ;;  %v797_v40 = vshrl.u32 %v769_v35, 16 }
 0x238   :  { %v806_v42 = vrot.slane %v804_v36, 1 }
 0x239   :  { %v801_v41 = vrot.slane %v799_v38, 1  ;;  %v1009_v43 = vsel %vm292_vm2, %v1007_v39, %v1008_v37  ;;  %vm1189_vm2 = vcmask 1041152  }
 0x23a   :  { %v810_v47 = vor.u32 %v808_v44, %v806_v42 }
 0x23b   :  { %v802_v45 = vor.u32 %v801_v41, %v797_v40 }
 0x23d   :  { %v807_v46 = vsel %vm108_vm0, %v802_v45, %v806_v42  ;;  %vm3504_vm0 = vmor %vm1173_vm14, %vm1172_vm13 }
 0x23e   :  { %2908 = vmatprep.mubr.msk.bf16.mxu0 %vm847_vm4, %v807_v46 }
 0x23f   :  { %2909 = vmatmul.mubr.msk.bf16.vlgmr.msra.gmra.mrb[4].mxu0 %vm847_vm4, %v810_v47 }
 0x240   :  { %2913 = vmatpush3.bf16.msra.mxu0 %v3085_v20  ;;  %2924 = vmatprep.mubr.msk.bf16.mxu0 %vm847_vm4, %v769_v35 }
 0x241   :  { %2914 = vmatprep.subr.bf16.mxu0 %v3086_v48 }
 0x244   :  { %2915 = vmatpush3.bf16.msra.mxu0 %v3086_v48 }
 0x245   :  { %2916 = vmatprep.subr.bf16.mxu0 %v3087_v49 }
 0x248   :  { %2917 = vmatpush3.bf16.msra.mxu0 %v3087_v49 }
 0x249   :  { %2918 = vmatprep.subr.bf16.mxu0 %v3088_v50 }
 0x24c   :  { %2919 = vmatpush3.bf16.msra.mxu0 %v3088_v50 }
 0x24d   :  { %2920 = vmatprep.subr.bf16.mxu0 %v3089_v51 }
 0x250   :  { %2921 = vmatpush3.bf16.msra.mxu0 %v3089_v51 }
 0x251   :  { %2922 = vmatprep.subr.bf16.mxu0 %v3090_v52 }
 0x254   :  { %2923 = vmatpush3.bf16.msra.mxu0 %v3090_v52 }
 0x255   :  { %2928 = vmatprep.subr.bf16.mxu0 %v3091_v53 }
 0x257   :  { %2925 = vmatmul.mubr.msk.bf16.vlgmr.msra.gmra.mrb[4].mxu0 %vm847_vm4, %v770_v34 }
 0x258   :  { %2929 = vmatpush3.bf16.msra.mxu0 %v3091_v53  ;;  %2940 = vmatprep.mubr.msk.bf16.mxu0 %vm847_vm4, %v1009_v43 }
 0x259   :  { %2930 = vmatprep.subr.bf16.mxu0 %v3092_v54 }
 0x25c   :  { %2931 = vmatpush3.bf16.msra.mxu0 %v3092_v54 }
 0x25d   :  { %2932 = vmatprep.subr.bf16.mxu0 %v3093_v55 }
 0x260   :  { %2933 = vmatpush3.bf16.msra.mxu0 %v3093_v55 }
 0x261   :  { %2934 = vmatprep.subr.bf16.mxu0 %v3094_v56 }
 0x264   :  { %2935 = vmatpush3.bf16.msra.mxu0 %v3094_v56 }
 0x265   :  { %2936 = vmatprep.subr.bf16.mxu0 %v3095_v57 }
 0x268   :  { %2937 = vmatpush3.bf16.msra.mxu0 %v3095_v57 }
 0x269   :  { %2938 = vmatprep.subr.bf16.mxu0 %v3096_v58 }
 0x26c   :  { %2939 = vmatpush3.bf16.msra.mxu0 %v3096_v58 }
 0x26f   :  { %2941 = vmatmul.mubr.msk.bf16.vlgmr.msra.gmra.mrb[4].mxu0 %vm847_vm4, %v1008_v37 }
 0x342   :  { %v2942_v1 = vpop.f32.mrb[4].mxu0 }
 0x343   :  { %v1114_v2 = vadd.f32 %v2942_v1, %v2617_v0  ;;  %v1086_v3 = vpop.f32.mrb[5].mxu0 }
 0x344   :  { %v1112_v5 = vadd.f32 %v2617_v0, %v1086_v3  ;;  %v2943_v6 = vpop.f32.mrb[6].mxu0 }
 0x345   :  { %v1118_v7 = vmax.f32 %v1114_v2, 0.0  ;;  %v1115_v8 = vadd.f32 %v2943_v6, %v2617_v0  ;;  %v1089_v9 = vpop.f32.mrb[7].mxu0 }
 0x346   :  { %v1116_v10 = vmax.f32 %v1112_v5, 0.0  ;;  %v1113_v11 = vadd.f32 %v2617_v0, %v1089_v9 }
 0x347   :  { %1217 = vst.msk [vmem:[#allocation4 + $0x1] sm:$0x1] %vm1120_vm5, %v1118_v7  ;;  %v1247_v12 = vcombine.high %v1118_v7, %v1118_v7  ;;  %v1119_v13 = vmax.f32 %v1115_v8, 0.0  ;;  %v1225_v14 = vrot.slane %v1118_v7, %v3475_v4 }
 0x348   :  { %1121 = vst.msk [vmem:[#allocation4] sm:$0x1] %vm1120_vm5, %v1116_v10  ;;  %v1117_v15 = vmax.f32 %v1113_v11, 0.0  ;;  %v1129_v16 = vrot.slane %v1116_v10, %v3475_v4  ;;  %v1159_v19 = vcombine.high %v1116_v10, %v1116_v10 }
 0x349   :  { %1280 = vst.msk [vmem:[#allocation4 + $0xb] sm:$0x1] %vm1120_vm5, %v1119_v13  ;;  %v1254_v17 = vrot.slane %v1247_v12, %v3475_v4  ;;  %v2623_v18 = vrot.slane %v1225_v14, 9  ;;  %v1234_v20 = vcombine.high %v1225_v14, %v1225_v14  ;;  %v1288_v24 = vrot.slane %v1119_v13, %v3475_v4 }
 0x34a   :  { %1200 = vst.msk [vmem:[#allocation4 + $0xa] sm:$0x1] %vm1120_vm5, %v1117_v15  ;;  %v2618_v21 = vrot.slane %v1129_v16, 9  ;;  %v1166_v23 = vrot.slane %v1159_v19, %v3475_v4  ;;  %v1142_v26 = vcombine.high %v1129_v16, %v1129_v16  ;;  %v1208_v28 = vrot.slane %v1117_v15, %v3475_v4 }
 0x34b   :  { %1255 = vrot.lane.b32.xlu1 %v1254_v17, %s3172_s23  ;;  %1228 = vrot.lane.b32.xlu0 %v2623_v18, %s3179_s5  ;;  %v2624_v22 = vrot.slane %v1234_v20, 9  ;;  %v1267_v25 = vcombine.high %v1254_v17, %v1254_v17  ;;  %v2627_v27 = vrot.slane %v1288_v24, 9  ;;  %v2625_v32 = vrot.slane %v1254_v17, 9 }
 0x34c   :  { %v1183_v29 = vcombine.high %v1166_v23, %v1166_v23  ;;  %v2622_v30 = vrot.slane %v1208_v28, 9  ;;  %v2619_v31 = vrot.slane %v1142_v26, 9  ;;  %v2620_v33 = vrot.slane %v1166_v23, 9 }
 0x34d   :  { %v2626_v34 = vrot.slane %v1267_v25, 9  ;;  %vm1190_vm5 = vcmask 387074  }
 0x34e   :  { %v2621_v35 = vrot.slane %v1183_v29, 9  ;;  %vm1191_vm7 = vmor %vm1190_vm5, %vm1189_vm2 }
 0x34f   :  { %1235 = vrot.lane.b32.xlu1 %v1234_v20, %s3180_s6  ;;  %1132 = vrot.lane.b32.xlu0 %v2618_v21, %s3179_s5 }
 0x353   :  { %1241 = vrot.lane.b32.xlu1 %v2624_v22, %s3181_s7  ;;  %1167 = vrot.lane.b32.xlu0 %v1166_v23, %s3172_s23  ;;  %s3183_s23 = smov 16  }
 0x357   :  { %1268 = vrot.lane.b32.xlu1 %v1267_v25, %s3182_s20  ;;  %1143 = vrot.lane.b32.xlu0 %v1142_v26, %s3180_s6 }
 0x35b   :  { %1184 = vrot.lane.b32.xlu0 %v1183_v29, %s3182_s20  ;;  %1291 = vrot.lane.b32.xlu1 %v2627_v27, %s3179_s5 }
 0x35f   :  { %1150 = vrot.lane.b32.xlu1 %v2619_v31, %s3181_s7  ;;  %1211 = vrot.lane.b32.xlu0 %v2622_v30, %s3179_s5 }
 0x363   :  { %1263 = vrot.lane.b32.xlu1 %v2625_v32, %s3183_s23  ;;  %1178 = vrot.lane.b32.xlu0 %v2620_v33, %s3183_s23 }
 0x367   :  { %1276 = vrot.lane.b32.xlu1 %v2626_v34, %s3184_s26  ;;  %1195 = vrot.lane.b32.xlu0 %v2621_v35, %s3184_s26 }
 0x3bd   :  { %v1256_v36 = vpop.permute.xlu1 %1255  ;;  %v1229_v37 = vpop.permute.xlu0 %1228 }
 0x3be   :  { %v1230_v39 = vrot.slane %v1229_v37, 6  ;;  %v1257_v45 = vrot.slane %v1256_v36, 6 }
 0x3c0   :  { %v1231_v40 = vsel %vm1135_vm8, %v1230_v39, %v1229_v37  ;;  %v1258_v52 = vsel %vm148_vm1, %v1257_v45, %v1256_v36 }
 0x3c1   :  { %1233 = vst.msk [vmem:[#allocation4 + $0x1] sm:$0x5] %vm3489_vm9, %v1231_v40  ;;  %v1236_v41 = vpop.permute.xlu1 %1235  ;;  %v1133_v42 = vpop.permute.xlu0 %1132 }
 0x3c2   :  { %1238 = vst.msk [vmem:[#allocation4 + $0x3] sm:$0x1] %vm1146_vm10, %v1236_v41  ;;  %v1134_v43 = vrot.slane %v1133_v42, 6 }
 0x3c4   :  { %v1136_v44 = vsel %vm1135_vm8, %v1134_v43, %v1133_v42 }
 0x3c5   :  { %1141 = vst.msk [vmem:[#allocation4] sm:$0x5] %vm3489_vm9, %v1136_v44  ;;  %v1242_v46 = vpop.permute.xlu1 %1241  ;;  %v1168_v47 = vpop.permute.xlu0 %1167 }
 0x3c6   :  { %v1243_v49 = vrot.slane %v1242_v46, 6  ;;  %v1169_v59 = vrot.slane %v1168_v47, 6 }
 0x3c8   :  { %v1244_v51 = vsel %vm482_vm3, %v1243_v49, %v1242_v46  ;;  %v1170_v6 = vsel %vm148_vm1, %v1169_v59, %v1168_v47 }
 0x3c9   :  { %1246 = vst.msk [vmem:[#allocation4 + $0x3] sm:$0x5] %vm3500_vm15, %v1244_v51  ;;  %v1269_v53 = vpop.permute.xlu1 %1268  ;;  %v1144_v54 = vpop.permute.xlu0 %1143 }
 0x3ca   :  { %1147 = vst.msk [vmem:[#allocation4 + $0x2] sm:$0x1] %vm1146_vm10, %v1144_v54  ;;  %v1270_v62 = vrot.slane %v1269_v53, 6 }
 0x3cb   :  { %1260 = vst.msk [vmem:[#allocation4 + $0x5] sm:$0x5] %vm3504_vm0, %v1258_v52 }
 0x3cc   :  { %v1271_v9 = vsel %vm847_vm4, %v1270_v62, %v1269_v53 }
 0x3cd   :  { %v1185_v55 = vpop.permute.xlu0 %1184  ;;  %v1292_v56 = vpop.permute.xlu1 %1291 }
 0x3ce   :  { %v1293_v57 = vrot.slane %v1292_v56, 6  ;;  %v1186_v2 = vrot.slane %v1185_v55, 6 }
 0x3d0   :  { %v1294_v58 = vsel %vm1135_vm8, %v1293_v57, %v1292_v56  ;;  %v1187_v10 = vsel %vm847_vm4, %v1186_v2, %v1185_v55 }
 0x3d1   :  { %1296 = vst.msk [vmem:[#allocation4 + $0xb] sm:$0x5] %vm3489_vm9, %v1294_v58  ;;  %v1151_v60 = vpop.permute.xlu1 %1150  ;;  %v1212_v61 = vpop.permute.xlu0 %1211 }
 0x3d2   :  { %v1152_v0 = vrot.slane %v1151_v60, 6  ;;  %v1213_v1 = vrot.slane %v1212_v61, 6 }
 0x3d4   :  { %v1153_v3 = vsel %vm482_vm3, %v1152_v0, %v1151_v60  ;;  %v1214_v5 = vsel %vm1135_vm8, %v1213_v1, %v1212_v61  ;;  %vm1198_vm3 = vcmask 1040768  }
 0x3d5   :  { %1158 = vst.msk [vmem:[#allocation4 + $0x2] sm:$0x5] %vm3500_vm15, %v1153_v3  ;;  %v1264_v7 = vpop.permute.xlu1 %1263  ;;  %v1179_v8 = vpop.permute.xlu0 %1178 }
 0x3d6   :  { %1216 = vst.msk [vmem:[#allocation4 + $0xa] sm:$0x5] %vm3489_vm9, %v1214_v5 }
 0x3d7   :  { %1266 = vst.msk [vmem:[#allocation4 + $0x7] sm:$0x1] %vm1181_vm6, %v1264_v7 }
 0x3d8   :  { %1175 = vst.msk [vmem:[#allocation4 + $0x4] sm:$0x5] %vm3504_vm0, %v1170_v6 }
 0x3d9   :  { %1182 = vst.msk [vmem:[#allocation4 + $0x6] sm:$0x1] %vm1181_vm6, %v1179_v8  ;;  %v1277_v11 = vpop.permute.xlu1 %1276  ;;  %v1196_v12 = vpop.permute.xlu0 %1195 }
 0x3da   :  { %1273 = vst.msk [vmem:[#allocation4 + $0x7] sm:$0x5] %vm1191_vm7, %v1271_v9  ;;  %1192 = vst.msk [vmem:[#allocation4 + $0x6] sm:$0x5] %vm1191_vm7, %v1187_v10 }
 0x3db   :  { %1279 = vst.msk [vmem:[#allocation4 + $0x9] sm:$0x1] %vm1198_vm3, %v1277_v11  ;;  %1199 = vst.msk [vmem:[#allocation4 + $0x8] sm:$0x1] %vm1198_vm3, %v1196_v12 }
 0x3dc   :  { %3165 = dma.done.wait [#allocation3], 25600 }
 0x3dd   :  { %3166 = vsyncadd [#allocation3], 4294941696  ;;  %v3185_v13 = vmov 0   ;;  %v1353_v14 = vld [vmem:[#allocation2 + $0x8] sm:$0xff]  ;;  %v1352_v16 = vld [vmem:[#allocation2] sm:$0xff]  ;;  %vm1574_vm4 = vcmask 261120  }
 0x3de   :  { %1733 = vmatprep.mubr.bf16.mxu0 %v3185_v13  ;;  %v1545_v15 = vld [vmem:[#allocation2 + $0x608] sm:$0xff]  ;;  %1578 = vmatprep.subr.bf16.mxu1 %v1353_v14  ;;  %v1544_v17 = vld [vmem:[#allocation2 + $0x600] sm:$0xff]  ;;  %v1355_v24 = vld [vmem:[#allocation2 + $0x18] sm:$0xff]  ;;  %vm3187_vm8 = vmmov 0   ;;  %s3188_s23 = smov [#allocation5]   ;;  %vm2454_vm9 = vcmask 41984  }
 0x3df   :  { %1701 = vmatprep.subr.bf16.mxu0 %v1545_v15  ;;  %v1357_v18 = vld [vmem:[#allocation2 + $0x28] sm:$0xff]  ;;  %1579 = vmatpush1.bf16.msra.mxu1 %v1352_v16  ;;  %v1356_v20 = vld [vmem:[#allocation2 + $0x20] sm:$0xff]  ;;  %v1354_v29 = vld [vmem:[#allocation2 + $0x10] sm:$0xff] }
 0x3e0   :  { %v1549_v19 = vld [vmem:[#allocation2 + $0x628] sm:$0xff]  ;;  %1702 = vmatpush1.bf16.msra.mxu0 %v1544_v17  ;;  %1580 = vmatprep.subr.bf16.mxu1 %v1357_v18  ;;  %v1548_v21 = vld [vmem:[#allocation2 + $0x620] sm:$0xff]  ;;  %v1359_v31 = vld [vmem:[#allocation2 + $0x38] sm:$0xff] }
 0x3e1   :  { %1703 = vmatprep.subr.bf16.mxu0 %v1549_v19  ;;  %v1361_v23 = vld [vmem:[#allocation2 + $0x48] sm:$0xff]  ;;  %v1360_v27 = vld [vmem:[#allocation2 + $0x40] sm:$0xff]  ;;  %v1358_v33 = vld [vmem:[#allocation2 + $0x30] sm:$0xff] }
 0x3e2   :  { %v3530_v22 = vld [vmem:[#allocation4 + $0x8] sm:$0x3f]  ;;  %v1364_v32 = vld [vmem:[#allocation2 + $0x60] sm:$0xff]  ;;  %v1363_v35 = vld [vmem:[#allocation2 + $0x58] sm:$0xff] }
 0x3e3   :  { %v1322_v25 = vcombine.high %v3530_v22, %v3530_v22  ;;  %1581 = vmatpush1.bf16.msra.mxu1 %v1356_v20  ;;  %v1365_v30 = vld [vmem:[#allocation2 + $0x68] sm:$0xff]  ;;  %v1368_v36 = vld [vmem:[#allocation2 + $0x80] sm:$0xff]  ;;  %v1362_v37 = vld [vmem:[#allocation2 + $0x50] sm:$0xff] }
 0x3e4   :  { %1704 = vmatpush1.bf16.msra.mxu0 %v1548_v21  ;;  %1582 = vmatprep.subr.bf16.mxu1 %v1361_v23  ;;  %v1369_v34 = vld [vmem:[#allocation2 + $0x88] sm:$0xff]  ;;  %v1367_v39 = vld [vmem:[#allocation2 + $0x78] sm:$0xff]  ;;  %v1372_v40 = vld [vmem:[#allocation2 + $0xa0] sm:$0xff] }
 0x3e5   :  { %v1336_v26 = vrot.slane %v1322_v25, %v3475_v4  ;;  %1742 = vmatprep.subr.bf16.mxu0 %v1355_v24  ;;  %v1373_v38 = vld [vmem:[#allocation2 + $0xa8] sm:$0xff]  ;;  %v1366_v41 = vld [vmem:[#allocation2 + $0x70] sm:$0xff]  ;;  %v1371_v43 = vld [vmem:[#allocation2 + $0x98] sm:$0xff] }
 0x3e6   :  { %v1377_v42 = vld [vmem:[#allocation2 + $0xc8] sm:$0xff]  ;;  %v3539_v44 = vld [vmem:[#allocation4] sm:$0xff]  ;;  %v1370_v47 = vld [vmem:[#allocation2 + $0x90] sm:$0xff] }
 0x3e7   :  { %v3535_v28 = vpack.c.bf16 %v1336_v26, %v1336_v26  ;;  %1583 = vmatpush1.bf16.msra.mxu1 %v1360_v27  ;;  %v3543_v45 = vrot.slane %v3539_v44, %v3475_v4  ;;  %v1376_v46 = vld [vmem:[#allocation2 + $0xc0] sm:$0xff]  ;;  %v1381_v48 = vld [vmem:[#allocation2 + $0xe8] sm:$0xff]  ;;  %v1375_v50 = vld [vmem:[#allocation2 + $0xb8] sm:$0xff]  ;;  %v1305_v15 = vcombine.high %v3539_v44, %v3539_v44 }
 0x3e8   :  { %1584 = vmatprep.subr.bf16.mxu1 %v1365_v30  ;;  %v1380_v52 = vld [vmem:[#allocation2 + $0xe0] sm:$0xff]  ;;  %v1374_v53 = vld [vmem:[#allocation2 + $0xb0] sm:$0xff]  ;;  %v1385_v54 = vld [vmem:[#allocation2 + $0x108] sm:$0xff] }
 0x3e9   :  { %2628 = vmatmul.mubr.msk.bf16.vlgmr.msra.gmra.mrb[8].mxu0 %vm1574_vm4, %v3535_v28  ;;  %v1320_v49 = vcombine.high %v3543_v45, %v3543_v45  ;;  %v1379_v55 = vld [vmem:[#allocation2 + $0xd8] sm:$0xff]  ;;  %v1384_v56 = vld [vmem:[#allocation2 + $0x100] sm:$0xff]  ;;  %v1378_v57 = vld [vmem:[#allocation2 + $0xd0] sm:$0xff]  ;;  %v3550_v20 = vrot.slane %v1305_v15, %v3475_v4 }
 0x3ea   :  { %1743 = vmatpush1.bf16.msra.mxu0 %v1354_v29  ;;  %v1389_v58 = vld [vmem:[#allocation2 + $0x128] sm:$0xff]  ;;  %v1383_v59 = vld [vmem:[#allocation2 + $0xf8] sm:$0xff]  ;;  %v1388_v60 = vld [vmem:[#allocation2 + $0x120] sm:$0xff] }
 0x3eb   :  { %1744 = vmatprep.subr.bf16.mxu0 %v1359_v31  ;;  %1585 = vmatpush1.bf16.msra.mxu1 %v1364_v32  ;;  %v1346_v51 = vpack.c.bf16 %v1320_v49, %v1320_v49  ;;  %v1382_v61 = vld [vmem:[#allocation2 + $0xf0] sm:$0xff]  ;;  %v1393_v62 = vld [vmem:[#allocation2 + $0x148] sm:$0xff]  ;;  %v1387_v0 = vld [vmem:[#allocation2 + $0x118] sm:$0xff]  ;;  %v1321_v26 = vcombine.high %v3550_v20, %v3550_v20  ;;  %v1345_v32 = vpack.c.bf16 %v3543_v45, %v3543_v45 }
 0x3ec   :  { %1586 = vmatprep.subr.bf16.mxu1 %v1369_v34  ;;  %v1392_v1 = vld [vmem:[#allocation2 + $0x140] sm:$0xff]  ;;  %v1386_v2 = vld [vmem:[#allocation2 + $0x110] sm:$0xff]  ;;  %v1397_v3 = vld [vmem:[#allocation2 + $0x168] sm:$0xff] }
 0x3ed   :  { %1610 = vmatprep.mubr.bf16.mxu1 %v1346_v51  ;;  %1774 = vmatprep.mubr.bf16.mxu0 %v1346_v51  ;;  %v1391_v5 = vld [vmem:[#allocation2 + $0x138] sm:$0xff]  ;;  %v1396_v6 = vld [vmem:[#allocation2 + $0x160] sm:$0xff]  ;;  %v1390_v7 = vld [vmem:[#allocation2 + $0x130] sm:$0xff] }
 0x3ee   :  { %1745 = vmatpush1.bf16.msra.mxu0 %v1358_v33  ;;  %v1401_v8 = vld [vmem:[#allocation2 + $0x188] sm:$0xff]  ;;  %v1395_v9 = vld [vmem:[#allocation2 + $0x158] sm:$0xff]  ;;  %v1400_v10 = vld [vmem:[#allocation2 + $0x180] sm:$0xff]  ;;  %v1348_v33 = vpack.c.bf16 %v1321_v26, %v1321_v26 }
 0x3ef   :  { %1746 = vmatprep.subr.bf16.mxu0 %v1363_v35  ;;  %1587 = vmatpush1.bf16.msra.mxu1 %v1368_v36  ;;  %v1394_v11 = vld [vmem:[#allocation2 + $0x150] sm:$0xff]  ;;  %v1405_v12 = vld [vmem:[#allocation2 + $0x1a8] sm:$0xff]  ;;  %v1399_v14 = vld [vmem:[#allocation2 + $0x178] sm:$0xff] }
 0x3f0   :  { %1588 = vmatprep.subr.bf16.mxu1 %v1373_v38  ;;  %v1404_v16 = vld [vmem:[#allocation2 + $0x1a0] sm:$0xff]  ;;  %v1398_v17 = vld [vmem:[#allocation2 + $0x170] sm:$0xff]  ;;  %v1409_v18 = vld [vmem:[#allocation2 + $0x1c8] sm:$0xff] }
 0x3f1   :  { %v1403_v19 = vld [vmem:[#allocation2 + $0x198] sm:$0xff]  ;;  %v1408_v21 = vld [vmem:[#allocation2 + $0x1c0] sm:$0xff]  ;;  %v1402_v23 = vld [vmem:[#allocation2 + $0x190] sm:$0xff] }
 0x3f2   :  { %1747 = vmatpush1.bf16.msra.mxu0 %v1362_v37  ;;  %v1413_v24 = vld [vmem:[#allocation2 + $0x1e8] sm:$0xff]  ;;  %v1407_v25 = vld [vmem:[#allocation2 + $0x1b8] sm:$0xff]  ;;  %v1412_v27 = vld [vmem:[#allocation2 + $0x1e0] sm:$0xff] }
 0x3f3   :  { %1748 = vmatprep.subr.bf16.mxu0 %v1367_v39  ;;  %1589 = vmatpush1.bf16.msra.mxu1 %v1372_v40  ;;  %v1406_v29 = vld [vmem:[#allocation2 + $0x1b0] sm:$0xff]  ;;  %v1417_v30 = vld [vmem:[#allocation2 + $0x208] sm:$0xff]  ;;  %v1411_v31 = vld [vmem:[#allocation2 + $0x1d8] sm:$0xff] }
 0x3f4   :  { %1590 = vmatprep.subr.bf16.mxu1 %v1377_v42  ;;  %v1416_v34 = vld [vmem:[#allocation2 + $0x200] sm:$0xff]  ;;  %v1410_v35 = vld [vmem:[#allocation2 + $0x1d0] sm:$0xff]  ;;  %v1421_v36 = vld [vmem:[#allocation2 + $0x228] sm:$0xff] }
 0x3f5   :  { %v1415_v37 = vld [vmem:[#allocation2 + $0x1f8] sm:$0xff]  ;;  %v1420_v38 = vld [vmem:[#allocation2 + $0x220] sm:$0xff]  ;;  %v1414_v39 = vld [vmem:[#allocation2 + $0x1f0] sm:$0xff] }
 0x3f6   :  { %1749 = vmatpush1.bf16.msra.mxu0 %v1366_v41  ;;  %v1425_v40 = vld [vmem:[#allocation2 + $0x248] sm:$0xff]  ;;  %v1419_v41 = vld [vmem:[#allocation2 + $0x218] sm:$0xff]  ;;  %v1424_v42 = vld [vmem:[#allocation2 + $0x240] sm:$0xff] }
 0x3f7   :  { %1750 = vmatprep.subr.bf16.mxu0 %v1371_v43  ;;  %1591 = vmatpush1.bf16.msra.mxu1 %v1376_v46  ;;  %v1418_v43 = vld [vmem:[#allocation2 + $0x210] sm:$0xff]  ;;  %v1429_v44 = vld [vmem:[#allocation2 + $0x268] sm:$0xff]  ;;  %v1423_v45 = vld [vmem:[#allocation2 + $0x238] sm:$0xff] }
 0x3f8   :  { %1592 = vmatprep.subr.bf16.mxu1 %v1381_v48  ;;  %v1428_v46 = vld [vmem:[#allocation2 + $0x260] sm:$0xff]  ;;  %v1433_v48 = vld [vmem:[#allocation2 + $0x288] sm:$0xff]  ;;  %v1427_v49 = vld [vmem:[#allocation2 + $0x258] sm:$0xff] }
 0x3f9   :  { %v1426_v51 = vld [vmem:[#allocation2 + $0x250] sm:$0xff]  ;;  %v1461_v15 = vld [vmem:[#allocation2 + $0x368] sm:$0xff]  ;;  %v1463_v26 = vld [vmem:[#allocation2 + $0x378] sm:$0xff] }
 0x3fa   :  { %1751 = vmatpush1.bf16.msra.mxu0 %v1370_v47  ;;  %v1422_v47 = vld [vmem:[#allocation2 + $0x230] sm:$0xff] }
 0x3fb   :  { %1752 = vmatprep.subr.bf16.mxu0 %v1375_v50  ;;  %1593 = vmatpush1.bf16.msra.mxu1 %v1380_v52  ;;  %v1432_v50 = vld [vmem:[#allocation2 + $0x280] sm:$0xff]  ;;  %v1437_v52 = vld [vmem:[#allocation2 + $0x2a8] sm:$0xff] }
 0x3fc   :  { %1594 = vmatprep.subr.bf16.mxu1 %v1385_v54  ;;  %v1436_v54 = vld [vmem:[#allocation2 + $0x2a0] sm:$0xff] }
 0x3fe   :  { %1753 = vmatpush1.bf16.msra.mxu0 %v1374_v53  ;;  %v1431_v53 = vld [vmem:[#allocation2 + $0x278] sm:$0xff] }
 0x3ff   :  { %1754 = vmatprep.subr.bf16.mxu0 %v1379_v55  ;;  %1595 = vmatpush1.bf16.msra.mxu1 %v1384_v56  ;;  %v1430_v55 = vld [vmem:[#allocation2 + $0x270] sm:$0xff]  ;;  %v1441_v56 = vld [vmem:[#allocation2 + $0x2c8] sm:$0xff] }
 0x400   :  { %1596 = vmatprep.subr.bf16.mxu1 %v1389_v58  ;;  %v1440_v58 = vld [vmem:[#allocation2 + $0x2c0] sm:$0xff] }
 0x402   :  { %1755 = vmatpush1.bf16.msra.mxu0 %v1378_v57  ;;  %v1435_v57 = vld [vmem:[#allocation2 + $0x298] sm:$0xff] }
 0x403   :  { %1756 = vmatprep.subr.bf16.mxu0 %v1383_v59  ;;  %1597 = vmatpush1.bf16.msra.mxu1 %v1388_v60  ;;  %v1434_v59 = vld [vmem:[#allocation2 + $0x290] sm:$0xff]  ;;  %v1445_v60 = vld [vmem:[#allocation2 + $0x2e8] sm:$0xff] }
 0x404   :  { %1598 = vmatprep.subr.bf16.mxu1 %v1393_v62  ;;  %v1444_v62 = vld [vmem:[#allocation2 + $0x2e0] sm:$0xff] }
 0x406   :  { %1757 = vmatpush1.bf16.msra.mxu0 %v1382_v61  ;;  %v1439_v61 = vld [vmem:[#allocation2 + $0x2b8] sm:$0xff] }
 0x407   :  { %1758 = vmatprep.subr.bf16.mxu0 %v1387_v0  ;;  %1599 = vmatpush1.bf16.msra.mxu1 %v1392_v1  ;;  %v1438_v0 = vld [vmem:[#allocation2 + $0x2b0] sm:$0xff]  ;;  %v1449_v1 = vld [vmem:[#allocation2 + $0x308] sm:$0xff] }
 0x408   :  { %1600 = vmatprep.subr.bf16.mxu1 %v1397_v3  ;;  %v1448_v3 = vld [vmem:[#allocation2 + $0x300] sm:$0xff] }
 0x40a   :  { %1759 = vmatpush1.bf16.msra.mxu0 %v1386_v2  ;;  %v1443_v2 = vld [vmem:[#allocation2 + $0x2d8] sm:$0xff] }
 0x40b   :  { %1760 = vmatprep.subr.bf16.mxu0 %v1391_v5  ;;  %1601 = vmatpush1.bf16.msra.mxu1 %v1396_v6  ;;  %v1442_v5 = vld [vmem:[#allocation2 + $0x2d0] sm:$0xff]  ;;  %v1453_v6 = vld [vmem:[#allocation2 + $0x328] sm:$0xff] }
 0x40c   :  { %1602 = vmatprep.subr.bf16.mxu1 %v1401_v8  ;;  %v1452_v8 = vld [vmem:[#allocation2 + $0x320] sm:$0xff] }
 0x40e   :  { %1761 = vmatpush1.bf16.msra.mxu0 %v1390_v7  ;;  %v1447_v7 = vld [vmem:[#allocation2 + $0x2f8] sm:$0xff] }
 0x40f   :  { %1762 = vmatprep.subr.bf16.mxu0 %v1395_v9  ;;  %1603 = vmatpush1.bf16.msra.mxu1 %v1400_v10  ;;  %v1446_v9 = vld [vmem:[#allocation2 + $0x2f0] sm:$0xff]  ;;  %v1457_v10 = vld [vmem:[#allocation2 + $0x348] sm:$0xff] }
 0x410   :  { %1604 = vmatprep.subr.bf16.mxu1 %v1405_v12  ;;  %v1456_v12 = vld [vmem:[#allocation2 + $0x340] sm:$0xff] }
 0x412   :  { %1763 = vmatpush1.bf16.msra.mxu0 %v1394_v11  ;;  %v1451_v11 = vld [vmem:[#allocation2 + $0x318] sm:$0xff] }
 0x413   :  { %1764 = vmatprep.subr.bf16.mxu0 %v1399_v14  ;;  %1605 = vmatpush1.bf16.msra.mxu1 %v1404_v16  ;;  %v1450_v14 = vld [vmem:[#allocation2 + $0x310] sm:$0xff]  ;;  %v1455_v16 = vld [vmem:[#allocation2 + $0x338] sm:$0xff] }
 0x414   :  { %1606 = vmatprep.subr.bf16.mxu1 %v1409_v18  ;;  %v1454_v18 = vld [vmem:[#allocation2 + $0x330] sm:$0xff] }
 0x416   :  { %1765 = vmatpush1.bf16.msra.mxu0 %v1398_v17  ;;  %v1460_v17 = vld [vmem:[#allocation2 + $0x360] sm:$0xff] }
 0x417   :  { %1766 = vmatprep.subr.bf16.mxu0 %v1403_v19  ;;  %1607 = vmatpush1.bf16.msra.mxu1 %v1408_v21  ;;  %v1465_v19 = vld [vmem:[#allocation2 + $0x388] sm:$0xff]  ;;  %v1459_v21 = vld [vmem:[#allocation2 + $0x358] sm:$0xff] }
 0x418   :  { %1608 = vmatprep.subr.bf16.mxu1 %v1413_v24  ;;  %v1458_v24 = vld [vmem:[#allocation2 + $0x350] sm:$0xff] }
 0x41a   :  { %1767 = vmatpush1.bf16.msra.mxu0 %v1402_v23  ;;  %v1464_v23 = vld [vmem:[#allocation2 + $0x380] sm:$0xff] }
 0x41b   :  { %1768 = vmatprep.subr.bf16.mxu0 %v1407_v25  ;;  %1609 = vmatpush1.bf16.msra.mxu1 %v1412_v27  ;;  %v1469_v25 = vld [vmem:[#allocation2 + $0x3a8] sm:$0xff]  ;;  %v1468_v27 = vld [vmem:[#allocation2 + $0x3a0] sm:$0xff] }
 0x41c   :  { %1619 = vmatprep.subr.bf16.mxu1 %v1417_v30  ;;  %v1473_v30 = vld [vmem:[#allocation2 + $0x3c8] sm:$0xff] }
 0x41e   :  { %1769 = vmatpush1.bf16.msra.mxu0 %v1406_v29  ;;  %1611 = vmatmul.mubr.bf16.vlgmr.msra.gmra.mrb[4].mxu1 %v1345_v32  ;;  %v1462_v29 = vld [vmem:[#allocation2 + $0x370] sm:$0xff] }
 0x41f   :  { %1770 = vmatprep.subr.bf16.mxu0 %v1411_v31  ;;  %1620 = vmatpush1.bf16.msra.mxu1 %v1416_v34  ;;  %v1467_v31 = vld [vmem:[#allocation2 + $0x398] sm:$0xff]  ;;  %v1466_v34 = vld [vmem:[#allocation2 + $0x390] sm:$0xff] }
 0x420   :  { %1651 = vmatprep.mubr.bf16.mxu1 %v1348_v33  ;;  %1621 = vmatprep.subr.bf16.mxu1 %v1421_v36  ;;  %v1471_v36 = vld [vmem:[#allocation2 + $0x3b8] sm:$0xff] }
 0x422   :  { %1771 = vmatpush1.bf16.msra.mxu0 %v1410_v35  ;;  %v1477_v35 = vld [vmem:[#allocation2 + $0x3e8] sm:$0xff] }
 0x423   :  { %1772 = vmatprep.subr.bf16.mxu0 %v1415_v37  ;;  %1622 = vmatpush1.bf16.msra.mxu1 %v1420_v38  ;;  %v1476_v38 = vld [vmem:[#allocation2 + $0x3e0] sm:$0xff] }
 0x424   :  { %1623 = vmatprep.subr.bf16.mxu1 %v1425_v40  ;;  %v1481_v40 = vld [vmem:[#allocation2 + $0x408] sm:$0xff] }
 0x426   :  { %1773 = vmatpush1.bf16.msra.mxu0 %v1414_v39  ;;  %v1470_v39 = vld [vmem:[#allocation2 + $0x3b0] sm:$0xff] }
 0x427   :  { %1783 = vmatprep.subr.bf16.mxu0 %v1419_v41  ;;  %1624 = vmatpush1.bf16.msra.mxu1 %v1424_v42  ;;  %v1475_v41 = vld [vmem:[#allocation2 + $0x3d8] sm:$0xff]  ;;  %v1480_v42 = vld [vmem:[#allocation2 + $0x400] sm:$0xff] }
 0x428   :  { %1625 = vmatprep.subr.bf16.mxu1 %v1429_v44  ;;  %v1485_v44 = vld [vmem:[#allocation2 + $0x428] sm:$0xff] }
 0x429   :  { %1775 = vmatmul.mubr.bf16.vlgmr.msra.gmra.mrb[12].mxu0 %v1345_v32  ;;  %v3558_v32 = vrot.slane %v3530_v22, %v3475_v4  ;;  %v1347_v4 = vpack.c.bf16 %v3550_v20, %v3550_v20  ;;  %v1488_v20 = vld [vmem:[#allocation2 + $0x440] sm:$0xff] }
 0x42a   :  { %1784 = vmatpush1.bf16.msra.mxu0 %v1418_v43  ;;  %1815 = vmatprep.mubr.bf16.mxu0 %v1348_v33  ;;  %v1472_v33 = vld [vmem:[#allocation2 + $0x3c0] sm:$0xff]  ;;  %v1474_v43 = vld [vmem:[#allocation2 + $0x3d0] sm:$0xff] }
 0x42b   :  { %1785 = vmatprep.subr.bf16.mxu0 %v1423_v45  ;;  %1626 = vmatpush1.bf16.msra.mxu1 %v1428_v46  ;;  %v1337_v37 = vcombine.high %v3558_v32, %v3558_v32  ;;  %v1479_v45 = vld [vmem:[#allocation2 + $0x3f8] sm:$0xff]  ;;  %v1484_v46 = vld [vmem:[#allocation2 + $0x420] sm:$0xff] }
 0x42c   :  { %1627 = vmatprep.subr.bf16.mxu1 %v1433_v48  ;;  %v1489_v48 = vld [vmem:[#allocation2 + $0x448] sm:$0xff] }
 0x42d   :  { %v1350_v22 = vpack.c.bf16 %v1337_v37, %v1337_v37  ;;  %v1526_v37 = vld [vmem:[#allocation2 + $0x570] sm:$0xff] }
 0x42e   :  { %1786 = vmatpush1.bf16.msra.mxu0 %v1422_v47  ;;  %v1478_v47 = vld [vmem:[#allocation2 + $0x3f0] sm:$0xff] }
 0x42f   :  { %1787 = vmatprep.subr.bf16.mxu0 %v1427_v49  ;;  %1628 = vmatpush1.bf16.msra.mxu1 %v1432_v50  ;;  %v1483_v49 = vld [vmem:[#allocation2 + $0x418] sm:$0xff]  ;;  %v1482_v50 = vld [vmem:[#allocation2 + $0x410] sm:$0xff] }
 0x430   :  { %1629 = vmatprep.subr.bf16.mxu1 %v1437_v52  ;;  %v1487_v52 = vld [vmem:[#allocation2 + $0x438] sm:$0xff] }
 0x432   :  { %1788 = vmatpush1.bf16.msra.mxu0 %v1426_v51  ;;  %v1493_v51 = vld [vmem:[#allocation2 + $0x468] sm:$0xff] }
 0x433   :  { %1789 = vmatprep.subr.bf16.mxu0 %v1431_v53  ;;  %1630 = vmatpush1.bf16.msra.mxu1 %v1436_v54  ;;  %v1492_v53 = vld [vmem:[#allocation2 + $0x460] sm:$0xff]  ;;  %v1486_v54 = vld [vmem:[#allocation2 + $0x430] sm:$0xff] }
 0x434   :  { %1631 = vmatprep.subr.bf16.mxu1 %v1441_v56  ;;  %v1491_v56 = vld [vmem:[#allocation2 + $0x458] sm:$0xff] }
 0x436   :  { %1790 = vmatpush1.bf16.msra.mxu0 %v1430_v55  ;;  %v1497_v55 = vld [vmem:[#allocation2 + $0x488] sm:$0xff] }
 0x437   :  { %1791 = vmatprep.subr.bf16.mxu0 %v1435_v57  ;;  %1632 = vmatpush1.bf16.msra.mxu1 %v1440_v58  ;;  %v1496_v57 = vld [vmem:[#allocation2 + $0x480] sm:$0xff]  ;;  %v1490_v58 = vld [vmem:[#allocation2 + $0x450] sm:$0xff] }
 0x438   :  { %1633 = vmatprep.subr.bf16.mxu1 %v1445_v60  ;;  %v1495_v60 = vld [vmem:[#allocation2 + $0x478] sm:$0xff] }
 0x43a   :  { %1792 = vmatpush1.bf16.msra.mxu0 %v1434_v59  ;;  %v1501_v59 = vld [vmem:[#allocation2 + $0x4a8] sm:$0xff] }
 0x43b   :  { %1793 = vmatprep.subr.bf16.mxu0 %v1439_v61  ;;  %1634 = vmatpush1.bf16.msra.mxu1 %v1444_v62  ;;  %v1500_v61 = vld [vmem:[#allocation2 + $0x4a0] sm:$0xff]  ;;  %v1494_v62 = vld [vmem:[#allocation2 + $0x470] sm:$0xff] }
 0x43c   :  { %1635 = vmatprep.subr.bf16.mxu1 %v1449_v1  ;;  %v1499_v1 = vld [vmem:[#allocation2 + $0x498] sm:$0xff] }
 0x43e   :  { %1794 = vmatpush1.bf16.msra.mxu0 %v1438_v0  ;;  %v1505_v0 = vld [vmem:[#allocation2 + $0x4c8] sm:$0xff] }
 0x43f   :  { %1795 = vmatprep.subr.bf16.mxu0 %v1443_v2  ;;  %1636 = vmatpush1.bf16.msra.mxu1 %v1448_v3  ;;  %v1504_v2 = vld [vmem:[#allocation2 + $0x4c0] sm:$0xff]  ;;  %v1498_v3 = vld [vmem:[#allocation2 + $0x490] sm:$0xff] }
 0x440   :  { %1637 = vmatprep.subr.bf16.mxu1 %v1453_v6  ;;  %v1503_v6 = vld [vmem:[#allocation2 + $0x4b8] sm:$0xff] }
 0x442   :  { %1796 = vmatpush1.bf16.msra.mxu0 %v1442_v5  ;;  %v1509_v5 = vld [vmem:[#allocation2 + $0x4e8] sm:$0xff] }
 0x443   :  { %1797 = vmatprep.subr.bf16.mxu0 %v1447_v7  ;;  %1638 = vmatpush1.bf16.msra.mxu1 %v1452_v8  ;;  %v1508_v7 = vld [vmem:[#allocation2 + $0x4e0] sm:$0xff]  ;;  %v1502_v8 = vld [vmem:[#allocation2 + $0x4b0] sm:$0xff] }
 0x444   :  { %1639 = vmatprep.subr.bf16.mxu1 %v1457_v10  ;;  %v1507_v10 = vld [vmem:[#allocation2 + $0x4d8] sm:$0xff] }
 0x446   :  { %1798 = vmatpush1.bf16.msra.mxu0 %v1446_v9  ;;  %v1513_v9 = vld [vmem:[#allocation2 + $0x508] sm:$0xff] }
 0x447   :  { %1799 = vmatprep.subr.bf16.mxu0 %v1451_v11  ;;  %1640 = vmatpush1.bf16.msra.mxu1 %v1456_v12  ;;  %v1512_v11 = vld [vmem:[#allocation2 + $0x500] sm:$0xff]  ;;  %v1506_v12 = vld [vmem:[#allocation2 + $0x4d0] sm:$0xff] }
 0x448   :  { %1641 = vmatprep.subr.bf16.mxu1 %v1461_v15  ;;  %v1511_v15 = vld [vmem:[#allocation2 + $0x4f8] sm:$0xff] }
 0x44a   :  { %1800 = vmatpush1.bf16.msra.mxu0 %v1450_v14  ;;  %v1517_v14 = vld [vmem:[#allocation2 + $0x528] sm:$0xff] }
 0x44b   :  { %1801 = vmatprep.subr.bf16.mxu0 %v1455_v16  ;;  %1642 = vmatpush1.bf16.msra.mxu1 %v1460_v17  ;;  %v1516_v16 = vld [vmem:[#allocation2 + $0x520] sm:$0xff]  ;;  %v1510_v17 = vld [vmem:[#allocation2 + $0x4f0] sm:$0xff] }
 0x44c   :  { %1643 = vmatprep.subr.bf16.mxu1 %v1465_v19  ;;  %v1515_v19 = vld [vmem:[#allocation2 + $0x518] sm:$0xff] }
 0x44e   :  { %1802 = vmatpush1.bf16.msra.mxu0 %v1454_v18  ;;  %v1521_v18 = vld [vmem:[#allocation2 + $0x548] sm:$0xff] }
 0x44f   :  { %1803 = vmatprep.subr.bf16.mxu0 %v1459_v21  ;;  %1644 = vmatpush1.bf16.msra.mxu1 %v1464_v23  ;;  %v1520_v21 = vld [vmem:[#allocation2 + $0x540] sm:$0xff]  ;;  %v1514_v23 = vld [vmem:[#allocation2 + $0x510] sm:$0xff] }
 0x450   :  { %1645 = vmatprep.subr.bf16.mxu1 %v1469_v25  ;;  %v1519_v25 = vld [vmem:[#allocation2 + $0x538] sm:$0xff] }
 0x452   :  { %1804 = vmatpush1.bf16.msra.mxu0 %v1458_v24  ;;  %v1525_v24 = vld [vmem:[#allocation2 + $0x568] sm:$0xff] }
 0x453   :  { %1805 = vmatprep.subr.bf16.mxu0 %v1463_v26  ;;  %1646 = vmatpush1.bf16.msra.mxu1 %v1468_v27  ;;  %v1524_v26 = vld [vmem:[#allocation2 + $0x560] sm:$0xff]  ;;  %v1518_v27 = vld [vmem:[#allocation2 + $0x530] sm:$0xff] }
 0x454   :  { %1647 = vmatprep.subr.bf16.mxu1 %v1473_v30  ;;  %v1523_v30 = vld [vmem:[#allocation2 + $0x558] sm:$0xff] }
 0x456   :  { %1806 = vmatpush1.bf16.msra.mxu0 %v1462_v29  ;;  %v1529_v29 = vld [vmem:[#allocation2 + $0x588] sm:$0xff] }
 0x457   :  { %1807 = vmatprep.subr.bf16.mxu0 %v1467_v31  ;;  %1648 = vmatpush1.bf16.msra.mxu1 %v1472_v33  ;;  %v1528_v31 = vld [vmem:[#allocation2 + $0x580] sm:$0xff]  ;;  %v1522_v33 = vld [vmem:[#allocation2 + $0x550] sm:$0xff] }
 0x458   :  { %1649 = vmatprep.subr.bf16.mxu1 %v1477_v35  ;;  %v1527_v35 = vld [vmem:[#allocation2 + $0x578] sm:$0xff] }
 0x45a   :  { %1808 = vmatpush1.bf16.msra.mxu0 %v1466_v34  ;;  %v1533_v34 = vld [vmem:[#allocation2 + $0x5a8] sm:$0xff] }
 0x45b   :  { %1809 = vmatprep.subr.bf16.mxu0 %v1471_v36  ;;  %1650 = vmatpush1.bf16.msra.mxu1 %v1476_v38  ;;  %v1532_v36 = vld [vmem:[#allocation2 + $0x5a0] sm:$0xff]  ;;  %v1537_v38 = vld [vmem:[#allocation2 + $0x5c8] sm:$0xff] }
 0x45c   :  { %1660 = vmatprep.subr.bf16.mxu1 %v1481_v40  ;;  %v1536_v40 = vld [vmem:[#allocation2 + $0x5c0] sm:$0xff] }
 0x45e   :  { %1810 = vmatpush1.bf16.msra.mxu0 %v1470_v39  ;;  %1652 = vmatmul.mubr.bf16.vlgmr.msra.gmra.mrb[4].mxu1 %v1347_v4  ;;  %v1531_v39 = vld [vmem:[#allocation2 + $0x598] sm:$0xff] }
 0x45f   :  { %1811 = vmatprep.subr.bf16.mxu0 %v1475_v41  ;;  %1661 = vmatpush1.bf16.msra.mxu1 %v1480_v42  ;;  %v1530_v41 = vld [vmem:[#allocation2 + $0x590] sm:$0xff]  ;;  %v1540_v42 = vld [vmem:[#allocation2 + $0x5e0] sm:$0xff] }
 0x460   :  { %1692 = vmatprep.mubr.bf16.mxu1 %v1350_v22  ;;  %1662 = vmatprep.subr.bf16.mxu1 %v1485_v44  ;;  %v1534_v44 = vld [vmem:[#allocation2 + $0x5b0] sm:$0xff] }
 0x462   :  { %1812 = vmatpush1.bf16.msra.mxu0 %v1474_v43  ;;  %v3099_v43 = vld [vmem:[%s3739_s9 + $0x40] sm:$0xff]  }
 0x463   :  { %1813 = vmatprep.subr.bf16.mxu0 %v1479_v45  ;;  %1663 = vmatpush1.bf16.msra.mxu1 %v1484_v46  ;;  %v1349_v45 = vpack.c.bf16 %v3558_v32, %v3558_v32  ;;  %v1539_v46 = vld [vmem:[#allocation2 + $0x5d8] sm:$0xff]  ;;  %v3102_v32 = vld [vmem:[%s3739_s9 + $0x8] sm:$0xff]  }
 0x464   :  { %1664 = vmatprep.subr.bf16.mxu1 %v1489_v48  ;;  %v3101_v48 = vld [vmem:[%s3739_s9 + $0x48] sm:$0xff]  }
 0x466   :  { %1814 = vmatpush1.bf16.msra.mxu0 %v1478_v47  ;;  %v3100_v47 = vld [vmem:[%s3739_s9] sm:$0xff]  }
 0x467   :  { %1824 = vmatprep.subr.bf16.mxu0 %v1483_v49  ;;  %1665 = vmatpush1.bf16.msra.mxu1 %v1488_v20  ;;  %v1538_v49 = vld [vmem:[#allocation2 + $0x5d0] sm:$0xff]  ;;  %v1543_v20 = vld [vmem:[#allocation2 + $0x5f8] sm:$0xff] }
 0x468   :  { %1666 = vmatprep.subr.bf16.mxu1 %v1493_v51  ;;  %v1542_v51 = vld [vmem:[#allocation2 + $0x5f0] sm:$0xff] }
 0x469   :  { %1816 = vmatmul.mubr.bf16.vlgmr.msra.gmra.mrb[12].mxu0 %v1347_v4  ;;  %v1541_v4 = vld [vmem:[#allocation2 + $0x5e8] sm:$0xff] }
 0x46a   :  { %1825 = vmatpush1.bf16.msra.mxu0 %v1482_v50  ;;  %1856 = vmatprep.mubr.bf16.mxu0 %v1350_v22  ;;  %v1535_v22 = vld [vmem:[#allocation2 + $0x5b8] sm:$0xff]  ;;  %v3103_v50 = vld [vmem:[%s3739_s9 + $0x50] sm:$0xff]  }
 0x46b   :  { %1826 = vmatprep.subr.bf16.mxu0 %v1487_v52  ;;  %1667 = vmatpush1.bf16.msra.mxu1 %v1492_v53  ;;  %v1547_v52 = vld [vmem:[#allocation2 + $0x618] sm:$0xff]  ;;  %v3104_v53 = vld [vmem:[%s3739_s9 + $0x10] sm:$0xff]  }
 0x46c   :  { %1668 = vmatprep.subr.bf16.mxu1 %v1497_v55  ;;  %v3105_v55 = vld [vmem:[%s3739_s9 + $0x58] sm:$0xff]  }
 0x46e   :  { %1827 = vmatpush1.bf16.msra.mxu0 %v1486_v54  ;;  %v1546_v54 = vld [vmem:[#allocation2 + $0x610] sm:$0xff] }
 0x46f   :  { %1828 = vmatprep.subr.bf16.mxu0 %v1491_v56  ;;  %1669 = vmatpush1.bf16.msra.mxu1 %v1496_v57  ;;  %v1551_v56 = vld [vmem:[#allocation2 + $0x638] sm:$0xff] }
 0x470   :  { %1670 = vmatprep.subr.bf16.mxu1 %v1501_v59  ;;  %v3106_v57 = vld [vmem:[%s3739_s9 + $0x18] sm:$0xff]   ;;  %v1550_v59 = vld [vmem:[#allocation2 + $0x630] sm:$0xff] }
 0x472   :  { %1829 = vmatpush1.bf16.msra.mxu0 %v1490_v58  ;;  %v3107_v58 = vld [vmem:[%s3739_s9 + $0x60] sm:$0xff]  }
 0x473   :  { %1830 = vmatprep.subr.bf16.mxu0 %v1495_v60  ;;  %1671 = vmatpush1.bf16.msra.mxu1 %v1500_v61  ;;  %v3108_v60 = vld [vmem:[%s3739_s9 + $0x20] sm:$0xff]   ;;  %v3109_v61 = vld [vmem:[%s3739_s9 + $0x68] sm:$0xff]  }
 0x474   :  { %1672 = vmatprep.subr.bf16.mxu1 %v1505_v0 }
 0x476   :  { %1831 = vmatpush1.bf16.msra.mxu0 %v1494_v62 }
 0x477   :  { %1832 = vmatprep.subr.bf16.mxu0 %v1499_v1  ;;  %1673 = vmatpush1.bf16.msra.mxu1 %v1504_v2 }
 0x478   :  { %1674 = vmatprep.subr.bf16.mxu1 %v1509_v5  ;;  %v3112_v5 = vld [vmem:[%s3739_s9 + $0x30] sm:$0xff]  }
 0x47a   :  { %1833 = vmatpush1.bf16.msra.mxu0 %v1498_v3  ;;  %v3111_v3 = vld [vmem:[%s3739_s9 + $0x70] sm:$0xff]  }
 0x47b   :  { %1834 = vmatprep.subr.bf16.mxu0 %v1503_v6  ;;  %1675 = vmatpush1.bf16.msra.mxu1 %v1508_v7  ;;  %v3113_v6 = vld [vmem:[%s3739_s9 + $0x78] sm:$0xff]   ;;  %v3115_v7 = vld [vmem:[%s3739_s9 + $0xc0] sm:$0xff]  }
 0x47c   :  { %1676 = vmatprep.subr.bf16.mxu1 %v1513_v9  ;;  %v1552_v9 = vld [vmem:[%s3738_s8] sm:$0xf] }
 0x47e   :  { %1835 = vmatpush1.bf16.msra.mxu0 %v1502_v8  ;;  %v1556_v8 = vsub.s32 0, %v3469_v63 }
 0x47f   :  { %1836 = vmatprep.subr.bf16.mxu0 %v1507_v10  ;;  %1677 = vmatpush1.bf16.msra.mxu1 %v1512_v11  ;;  %v1560_v10 = vsub.s32 1, %v3469_v63 }
 0x480   :  { %1678 = vmatprep.subr.bf16.mxu1 %v1517_v14  ;;  %v1557_v11 = vrot.slane %v1552_v9, %v1556_v8 }
 0x482   :  { %1837 = vmatpush1.bf16.msra.mxu0 %v1506_v12  ;;  %v1561_v12 = vrot.slane %v1552_v9, %v1560_v10 }
 0x483   :  { %1838 = vmatprep.subr.bf16.mxu0 %v1511_v15  ;;  %1679 = vmatpush1.bf16.msra.mxu1 %v1516_v16 }
 0x484   :  { %1680 = vmatprep.subr.bf16.mxu1 %v1521_v18 }
 0x486   :  { %1839 = vmatpush1.bf16.msra.mxu0 %v1510_v17 }
 0x487   :  { %1840 = vmatprep.subr.bf16.mxu0 %v1515_v19  ;;  %1681 = vmatpush1.bf16.msra.mxu1 %v1520_v21 }
 0x488   :  { %1682 = vmatprep.subr.bf16.mxu1 %v1525_v24 }
 0x48a   :  { %1841 = vmatpush1.bf16.msra.mxu0 %v1514_v23 }
 0x48b   :  { %1842 = vmatprep.subr.bf16.mxu0 %v1519_v25  ;;  %1683 = vmatpush1.bf16.msra.mxu1 %v1524_v26 }
 0x48c   :  { %1684 = vmatprep.subr.bf16.mxu1 %v1529_v29 }
 0x48e   :  { %1843 = vmatpush1.bf16.msra.mxu0 %v1518_v27  ;;  %v3116_v27 = vld [vmem:[%s3739_s9 + $0x80] sm:$0xff]  }
 0x48f   :  { %1844 = vmatprep.subr.bf16.mxu0 %v1523_v30  ;;  %1685 = vmatpush1.bf16.msra.mxu1 %v1528_v31  ;;  %v3117_v30 = vld [vmem:[%s3739_s9 + $0xc8] sm:$0xff]  }
 0x490   :  { %1686 = vmatprep.subr.bf16.mxu1 %v1533_v34  ;;  %v3118_v31 = vld [vmem:[%s3739_s9 + $0x88] sm:$0xff]   ;;  %v1568_v34 = vsub.s32 3, %v3469_v63 }
 0x492   :  { %1845 = vmatpush1.bf16.msra.mxu0 %v1522_v33  ;;  %v3119_v33 = vld [vmem:[%s3739_s9 + $0xd0] sm:$0xff]  }
 0x493   :  { %1846 = vmatprep.subr.bf16.mxu0 %v1527_v35  ;;  %1687 = vmatpush1.bf16.msra.mxu1 %v1532_v36  ;;  %v3120_v35 = vld [vmem:[%s3739_s9 + $0x90] sm:$0xff]   ;;  %v3121_v36 = vld [vmem:[%s3739_s9 + $0xd8] sm:$0xff]  }
 0x494   :  { %1688 = vmatprep.subr.bf16.mxu1 %v1537_v38  ;;  %v3122_v38 = vld [vmem:[%s3739_s9 + $0x98] sm:$0xff]  }
 0x496   :  { %1847 = vmatpush1.bf16.msra.mxu0 %v1526_v37  ;;  %v1569_v37 = vrot.slane %v1552_v9, %v1568_v34 }
 0x497   :  { %1848 = vmatprep.subr.bf16.mxu0 %v1531_v39  ;;  %1689 = vmatpush1.bf16.msra.mxu1 %v1536_v40  ;;  %v3123_v40 = vld [vmem:[%s3739_s9 + $0xe0] sm:$0xff]  }
 0x498   :  { %1690 = vmatprep.subr.bf16.mxu1 %v1541_v4 }
 0x49a   :  { %1849 = vmatpush1.bf16.msra.mxu0 %v1530_v41 }
 0x49b   :  { %1850 = vmatprep.subr.bf16.mxu0 %v1535_v22  ;;  %1691 = vmatpush1.bf16.msra.mxu1 %v1540_v42 }
 0x49c   :  { %2748 = vmatprep.subr.bf16.mxu1 %v3099_v43  ;;  %v3124_v43 = vld [vmem:[%s3739_s9 + $0xa0] sm:$0xff]  }
 0x49e   :  { %1851 = vmatpush1.bf16.msra.mxu0 %v1534_v44  ;;  %1693 = vmatmul.mubr.bf16.vlgmr.msra.gmra.mrb[4].mxu1 %v1349_v45  ;;  %v1564_v44 = vsub.s32 2, %v3469_v63  ;;  %v3128_v63 = vld [vmem:[%s3739_s9 + $0xb0] sm:$0xff]  }
 0x49f   :  { %1852 = vmatprep.subr.bf16.mxu0 %v1539_v46  ;;  %2749 = vmatpush3.bf16.msra.mxu1 %v3100_v47  ;;  %v3125_v46 = vld [vmem:[%s3739_s9 + $0xe8] sm:$0xff]  }
 0x4a0   :  { %2750 = vmatprep.subr.bf16.mxu1 %v3101_v48  ;;  %v3126_v48 = vld [vmem:[%s3739_s9 + $0xa8] sm:$0xff]  }
 0x4a2   :  { %1853 = vmatpush1.bf16.msra.mxu0 %v1538_v49  ;;  %v1565_v49 = vrot.slane %v1552_v9, %v1564_v44 }
 0x4a3   :  { %1854 = vmatprep.subr.bf16.mxu0 %v1543_v20  ;;  %2751 = vmatpush3.bf16.msra.mxu1 %v3102_v32  ;;  %v3127_v20 = vld [vmem:[%s3739_s9 + $0xf0] sm:$0xff]  }
 0x4a4   :  { %2752 = vmatprep.subr.bf16.mxu1 %v3103_v50  ;;  %v3129_v50 = vld [vmem:[%s3739_s9 + $0xf8] sm:$0xff]  }
 0x4a6   :  { %1855 = vmatpush1.bf16.msra.mxu0 %v1542_v51  ;;  %v3130_v51 = vld [vmem:[%s3739_s9 + $0xb8] sm:$0xff]  }
 0x4a7   :  { %1865 = vmatprep.subr.bf16.mxu0 %v1547_v52  ;;  %2753 = vmatpush3.bf16.msra.mxu1 %v3104_v53 }
 0x4a8   :  { %2754 = vmatprep.subr.bf16.mxu1 %v3105_v55  ;;  %v3186_v55 = vmov 0.0  }
 0x4a9   :  { %1857 = vmatmul.mubr.bf16.vlgmr.msra.gmra.mrb[12].mxu0 %v1349_v45 }
 0x4aa   :  { %1866 = vmatpush1.bf16.msra.mxu0 %v1546_v54  ;;  %1897 = vmatprep.mubr.bf16.mxu0 %v3185_v13  ;;  %v3110_v13 = vld [vmem:[%s3739_s9 + $0x28] sm:$0xff]   ;;  %v3131_v54 = vld [vmem:[%s3741_s11] sm:$0xff]  }
 0x4ab   :  { %1867 = vmatprep.subr.bf16.mxu0 %v1551_v56  ;;  %2755 = vmatpush3.bf16.msra.mxu1 %v3106_v57  ;;  %v3132_v56 = vld [vmem:[%s3741_s11 + $0x8] sm:$0xff]   ;;  %v3133_v57 = vld [vmem:[%s3741_s11 + $0x10] sm:$0xff]  }
 0x4ac   :  { %2756 = vmatprep.subr.bf16.mxu1 %v3107_v58  ;;  %v3134_v58 = vld [vmem:[%s3741_s11 + $0x18] sm:$0xff]  }
 0x4ae   :  { %1868 = vmatpush1.bf16.msra.mxu0 %v1550_v59  ;;  %v3135_v59 = vld [vmem:[%s3741_s11 + $0x20] sm:$0xff]  }
 0x4af   :  { %2757 = vmatpush3.bf16.msra.mxu1 %v3108_v60  ;;  %2944 = vmatprep.subr.bf16.mxu0 %v3186_v55  ;;  %v3136_v60 = vld [vmem:[%s3741_s11 + $0x28] sm:$0xff]  }
 0x4b0   :  { %2758 = vmatprep.subr.bf16.mxu1 %v3109_v61  ;;  %v3137_v61 = vld [vmem:[%s3741_s11 + $0x30] sm:$0xff]  }
 0x4b3   :  { %2759 = vmatpush3.bf16.msra.mxu1 %v3110_v13  ;;  %v3138_v13 = vld [vmem:[%s3741_s11 + $0x38] sm:$0xff]  }
 0x4b4   :  { %2760 = vmatprep.subr.bf16.mxu1 %v3111_v3 }
 0x4b5   :  { %2629 = vmatmul.mubr.msk.bf16.vlgmr.msra.gmra.mrb[12].mxu0 %vm1574_vm4, %v3535_v28  ;;  %v3114_v28 = vld [vmem:[%s3739_s9 + $0x38] sm:$0xff]  }
 0x4b6   :  { %2945 = vmatpush3.bf16.msra.mxu0 %v3131_v54  ;;  %2960 = vmatprep.mubr.msk.bf16.mxu0 %vm3187_vm8, %v3186_v55 }
 0x4b7   :  { %2761 = vmatpush3.bf16.msra.mxu1 %v3112_v5  ;;  %2946 = vmatprep.subr.bf16.mxu0 %v3186_v55 }
 0x4b8   :  { %2762 = vmatprep.subr.bf16.mxu1 %v3113_v6 }
 0x4ba   :  { %2947 = vmatpush3.bf16.msra.mxu0 %v3132_v56 }
 0x4bb   :  { %2763 = vmatpush3.bf16.msra.mxu1 %v3114_v28  ;;  %2948 = vmatprep.subr.bf16.mxu0 %v3186_v55  ;;  %v2630_v28 = vld [vmem:[%s3740_s10] ss:$0 sm:$0xff] }
 0x4bc   :  { %v1735_v62 = vpop.f32.mrb[8].mxu0  ;;  %2770 = vmatprep.subr.bf16.mxu1 %v3115_v7 }
 0x4bd   :  { %v1737_v0 = vpop.f32.mrb[9].mxu0 }
 0x4be   :  { %v1739_v1 = vpop.f32.mrb[10].mxu0  ;;  %2949 = vmatpush3.bf16.msra.mxu0 %v3133_v57 }
 0x4bf   :  { %v1740_v2 = vpop.f32.mrb[11].mxu0  ;;  %2950 = vmatprep.subr.bf16.mxu0 %v3186_v55 }
 0x4c2   :  { %2951 = vmatpush3.bf16.msra.mxu0 %v3134_v58 }
 0x4c3   :  { %2952 = vmatprep.subr.bf16.mxu0 %v3186_v55 }
 0x4c6   :  { %2953 = vmatpush3.bf16.msra.mxu0 %v3135_v59 }
 0x4c7   :  { %2954 = vmatprep.subr.bf16.mxu0 %v3186_v55 }
 0x4ca   :  { %2955 = vmatpush3.bf16.msra.mxu0 %v3136_v60 }
 0x4cb   :  { %2956 = vmatprep.subr.bf16.mxu0 %v3186_v55 }
 0x4ce   :  { %2957 = vmatpush3.bf16.msra.mxu0 %v3137_v61 }
 0x4cf   :  { %2958 = vmatprep.subr.bf16.mxu0 %v3186_v55 }
 0x4d2   :  { %2959 = vmatpush3.bf16.msra.mxu0 %v3138_v13 }
 0x571   :  { %v1694_v14 = vpop.f32.mrb[4].mxu1 }
 0x572   :  { %v2976_v15 = vadd.f32 %v1694_v14, %v1557_v11  ;;  %v1696_v16 = vpop.f32.mrb[5].mxu1 }
 0x573   :  { %v2978_v17 = vadd.f32 %v1696_v16, %v1561_v12  ;;  %v1698_v18 = vpop.f32.mrb[6].mxu1 }
 0x574   :  { %v2977_v19 = vadd.f32 %v2976_v15, %v1735_v62  ;;  %v1699_v21 = vpop.f32.mrb[7].mxu1  ;;  %v3139_v62 = vld [vmem:[%s3743_s13] sm:$0xff]   ;;  %v3142_v18 = vld [vmem:[%s3743_s13 + $0x18] sm:$0xff]  }
 0x575   :  { %v2979_v23 = vadd.f32 %v2978_v17, %v1737_v0  ;;  %v3140_v0 = vld [vmem:[%s3743_s13 + $0x8] sm:$0xff]   ;;  %v3141_v17 = vld [vmem:[%s3743_s13 + $0x10] sm:$0xff]   ;;  %s2462_s13 = sshll.u32 %s3188_s23, 4  ;;  %s2463_s13 = int_to_ptr.vmem [resolvable:$true] %s2462_s13 }
 0x576   :  { %v1906_v24 = vmax.f32 %v2977_v19, 0.0  ;;  %v2663_v19 = vld [vmem:[%s3742_s12] ss:$0 sm:$0xff]  ;;  %s3143_s12 = scalar_lea.vmem %s2463_s13, 32  ;;  %p3148_p1 = scmp.lt.s32.totalorder %s2463_s13, %s2463_s13 }
 0x577   :  { %v1907_v25 = vmax.f32 %v2979_v23, 0.0  ;;  %p3144_p0 = scmp.ne.s32.totalorder %s2463_s13, %s3143_s12  ;;  %p3149_p2 = scmp.lt.s32.totalorder %s3143_s12, %s3143_s12 }
 0x578   :  { %v1910_v29 = vpack.c.bf16 %v1906_v24, %v1906_v24 }
 0x579   :  { %v1911_v26 = vpack.c.bf16 %v1907_v25, %v1907_v25  ;;  %p3150_p3 = por %p3149_p2, %p3148_p1 }
 0x57b   :  { %2209 = vmatprep.mubr.bf16.mxu1 %v1911_v26  ;;  %p3151_p4 = pnand %p3150_p3, %p3144_p0 }
 0x57c   :  { %2210 = vmatmul.mubr.bf16.vlgmr.msra.gmra.mrb[8].mxu1 %v1910_v29 }
 0x57d   :  { %2771 = vmatpush3.bf16.msra.mxu1 %v3116_v27 }
 0x57e   :  { %2772 = vmatprep.subr.bf16.mxu1 %v3117_v30  ;;  %v2672_v30 = vld [vmem:[%s3744_s14] ss:$0 sm:$0xff] }
 0x581   :  { %2773 = vmatpush3.bf16.msra.mxu1 %v3118_v31 }
 0x582   :  { %2774 = vmatprep.subr.bf16.mxu1 %v3119_v33 }
 0x585   :  { %2775 = vmatpush3.bf16.msra.mxu1 %v3120_v35 }
 0x586   :  { %2776 = vmatprep.subr.bf16.mxu1 %v3121_v36 }
 0x588   :  { %v1899_v39 = vpop.f32.mrb[12].mxu0 }
 0x589   :  { %v1901_v41 = vpop.f32.mrb[13].mxu0  ;;  %2777 = vmatpush3.bf16.msra.mxu1 %v3122_v38  ;;  %v2980_v32 = vadd.f32 %v1899_v39, %v1565_v49 }
 0x58a   :  { %v2981_v4 = vadd.f32 %v1901_v41, %v1569_v37  ;;  %v1903_v22 = vpop.f32.mrb[14].mxu0  ;;  %2778 = vmatprep.subr.bf16.mxu1 %v3123_v40 }
 0x58b   :  { %v1904_v42 = vpop.f32.mrb[15].mxu0  ;;  %v1908_v52 = vmax.f32 %v2980_v32, 0.0 }
 0x58c   :  { %v1909_v45 = vmax.f32 %v2981_v4, 0.0 }
 0x58d   :  { %2779 = vmatpush3.bf16.msra.mxu1 %v3124_v43  ;;  %v1912_v53 = vpack.c.bf16 %v1908_v52, %v1908_v52 }
 0x58e   :  { %v1913_v47 = vpack.c.bf16 %v1909_v45, %v1909_v45  ;;  %2780 = vmatprep.subr.bf16.mxu1 %v3125_v46 }
 0x590   :  { %2249 = vmatprep.mubr.bf16.mxu1 %v1913_v47 }
 0x591   :  { %2781 = vmatpush3.bf16.msra.mxu1 %v3126_v48 }
 0x592   :  { %2782 = vmatprep.subr.bf16.mxu1 %v3127_v20 }
 0x595   :  { %2783 = vmatpush3.bf16.msra.mxu1 %v3128_v63 }
 0x596   :  { %2784 = vmatprep.subr.bf16.mxu1 %v3129_v50 }
 0x599   :  { %2785 = vmatpush3.bf16.msra.mxu1 %v3130_v51 }
 0x59a   :  { %2964 = vmatprep.subr.bf16.mxu1 %v3186_v55 }
 0x59c   :  { %2250 = vmatmul.mubr.bf16.vlgmr.msra.gmra.mrb[12].mxu1 %v1912_v53 }
 0x59d   :  { %2972 = vmatprep.mubr.msk.bf16.mxu1 %vm3187_vm8, %v3186_v55  ;;  %2965 = vmatpush3.bf16.msra.mxu1 %v3139_v62 }
 0x59e   :  { %2966 = vmatprep.subr.bf16.mxu1 %v3186_v55 }
 0x5a1   :  { %2967 = vmatpush3.bf16.msra.mxu1 %v3140_v0 }
 0x5a2   :  { %2968 = vmatprep.subr.bf16.mxu1 %v3186_v55 }
 0x5a5   :  { %2969 = vmatpush3.bf16.msra.mxu1 %v3141_v17 }
 0x5a6   :  { %2970 = vmatprep.subr.bf16.mxu1 %v3186_v55 }
 0x5a9   :  { %2971 = vmatpush3.bf16.msra.mxu1 %v3142_v18 }
 0x64f   :  { %v2764_v1 = vpop.f32.mrb[8].mxu1 }
 0x650   :  { %v2765_v2 = vpop.f32.mrb[9].mxu1 }
 0x651   :  { %v2766_v3 = vadd.f32 %v2765_v2, %v2764_v1  ;;  %v2767_v5 = vpop.f32.mrb[10].mxu1 }
 0x652   :  { %v2768_v6 = vpop.f32.mrb[11].mxu1 }
 0x653   :  { %v2212_v9 = vadd.f32 %v2766_v3, %v2630_v28 }
 0x66f   :  { %v2786_v7 = vpop.f32.mrb[12].mxu1 }
 0x670   :  { %v2787_v8 = vpop.f32.mrb[13].mxu1 }
 0x671   :  { %v2788_v10 = vadd.f32 %v2787_v8, %v2786_v7  ;;  %v2789_v11 = vpop.f32.mrb[14].mxu1 }
 0x672   :  { %v2790_v12 = vpop.f32.mrb[15].mxu1 }
 0x673   :  { %v2252_v14 = vadd.f32 %v2788_v10, %v2212_v9 }
 0x675   :  { %v2257_v15 = vmax.f32 %v2252_v14, 0.0 }
 0x677   :  { %v2258_v16 = vpack.c.bf16 %v2257_v15, %v2257_v15 }
 0x679   :  { %2961 = vmatmul.mubr.bf16.vlgmr.msra.gmra.mrb[16].mxu0 %v2258_v16 }
 0x74c   :  { %v2364_v21 = vpop.f32.mrb[16].mxu0 }
 0x74d   :  { %v2365_v23 = vadd.f32 %v2663_v19, %v2364_v21  ;;  %v2962_v24 = vpop.f32.mrb[17].mxu0 }
 0x74e   :  { %v2367_v25 = vpop.f32.mrb[18].mxu0 }
 0x74f   :  { %v2370_v26 = vmax.f32 %v2365_v23, 0.0  ;;  %v2963_v27 = vpop.f32.mrb[19].mxu0 }
 0x751   :  { %v2371_v29 = vpack.c.bf16 %v2370_v26, %v2370_v26 }
 0x753   :  { %2973 = vmatmul.mubr.msk.bf16.vlgmr.msra.gmra.mrb[16].mxu1 %vm148_vm1, %v2371_v29 }
 0x826   :  { %v2448_v31 = vpop.f32.mrb[16].mxu1 }
 0x827   :  { %v2449_v33 = vadd.f32 %v2672_v30, %v2448_v31  ;;  %v2974_v34 = vpop.f32.mrb[17].mxu1 }
 0x828   :  { %v2451_v35 = vpop.f32.mrb[18].mxu1 }
 0x829   :  { %v2975_v36 = vpop.f32.mrb[19].mxu1  ;;  %2455 = vst.msk [vmem:[#allocation5] sm:$0x3] %vm2454_vm9, %v2449_v33 }
 0x82a   :  { %3154 = shalt.err (!%p3151_p4)
}
 0x82b   :  { %s3155_s14 = scalar_lea.hbm %s3745_s15, 32 }
 0x82c   :  { %p3156_p5 = scmp.ne.s32.totalorder %s3745_s15, %s3155_s14  ;;  %p3159_p6 = scmp.lt.u32.totalorder %s3155_s14, %s3745_s15 }
 0x82e   :  { %p3161_p7 = pnand %p3159_p6, %p3156_p5 }
 0x830   :  { %3164 = shalt.err (!%p3161_p7)
}
 0x831   :  { %2465 = dma.vmem_to_hbm [thread:$0]  %s2463_s13, 32, %s3745_s15, [#allocation6]  }
 0x832   :  { %3167 = dma.done.wait [#allocation6], 32  }
 0x833   :  { %3168 = vsyncadd [#allocation6], 4294967264 }
 0x834   :  { %2469 = vsyncpa [#allocation6], 1 }
 0x835   :  { %2470 = vsyncmov [#allocation3] }
 0x838   :  { %s2471_s0 = vpop.sfrf %2470 }
 0x839   :  { %p2678_p8 = scmp.ne.s32.totalorder %s2471_s0, 0 }
 0x83b   :  { %2475 = shalt.err (%p2678_p8)  }

</bundles_post_ra>
